<compile_context>
chip_gen: v7x
topology: tpu7x:2x2x1
jax: 0.10.0
libtpu: 0.0.40
codegen_flags: <defaults>
</compile_context>

<pallas_src>
import jax
import jax.numpy as jnp
from jax.experimental import pallas as pl
from jax.experimental.pallas import tpu as pltpu


# ----------------------------------------------------------------------------
# Kernel
# ----------------------------------------------------------------------------
def mpl1_kernel(
    x_ref,                               # (TILE_B, 9) bf16
    # shared trunk: 9 -> 64 -> 256 -> 512
    w0_ref, b0_ref, w1_ref, b1_ref, w2_ref, b2_ref,
    # fused heads: 512 -> 512 -> 256 -> 4   (block-diagonal layers 2 & 3)
    wh0_ref, bh0_ref, wh1_ref, bh1_ref, wh2_ref, bh2_ref,
    # output: (TILE_B, 4) f32 : cols 0..2 = tanh head, col 3 = sigmoid head
    out_ref,
):
    def linear(h_bf16, w_ref, b_ref):
        # bf16 x bf16 matmul on the MXU, f32 accumulation, f32 bias add.
        return (
            jnp.dot(h_bf16, w_ref[...], preferred_element_type=jnp.float32)
            + b_ref[...]
        )

    def relu_bf16(y_f32):
        # ReLU in f32 on the VPU, re-pack to bf16 for the next matmul.
        return jnp.maximum(y_f32, 0.0).astype(jnp.bfloat16)

    x = x_ref[...]                                   # bf16 (TILE_B, 9)

    # --- shared hidden trunk (Linear + ReLU) x3 ---
    h = relu_bf16(linear(x, w0_ref, b0_ref))         # (TILE_B, 64)
    h = relu_bf16(linear(h, w1_ref, b1_ref))         # (TILE_B, 256)
    h = relu_bf16(linear(h, w2_ref, b2_ref))         # (TILE_B, 512)

    # --- fused heads ---
    g = relu_bf16(linear(h, wh0_ref, bh0_ref))       # (TILE_B, 512)
    g = relu_bf16(linear(g, wh1_ref, bh1_ref))       # (TILE_B, 256)
    y = linear(g, wh2_ref, bh2_ref)                  # (TILE_B, 4) f32

    # cols 0..2 -> tanh (head 0), col 3 -> sigmoid (head 1)
    col = jax.lax.broadcasted_iota(jnp.int32, y.shape, 1)
    out = jnp.where(col < 3, jnp.tanh(y), jax.nn.sigmoid(y))
    out_ref[...] = out.astype(out_ref.dtype)


# ----------------------------------------------------------------------------
# Parameter packing (head fusion + bf16 weight cast)
# ----------------------------------------------------------------------------
def _block_diag(a, b):
    top = jnp.concatenate([a, jnp.zeros((a.shape[0], b.shape[1]), a.dtype)], axis=1)
    bot = jnp.concatenate([jnp.zeros((b.shape[0], a.shape[1]), b.dtype), b], axis=1)
    return jnp.concatenate([top, bot], axis=0)


def pack_params(params):
    """params: 9 (w, b) pairs in forward order (trunk, head0, head1).

    Returns 6 (w_bf16, b_f32) pairs: 3 trunk layers + 3 fused head layers.
    Head fusion is exact: layer A concatenates along N (shared input h),
    layers B/C are block-diagonal so the two head chains never mix.
    """
    (w0, b0), (w1, b1), (w2, b2) = params[0:3]
    (wa0, ba0), (wa1, ba1), (wa2, ba2) = params[3:6]
    (wb0, bb0), (wb1, bb1), (wb2, bb2) = params[6:9]

    wh0 = jnp.concatenate([wa0, wb0], axis=1)        # (512, 512)
    bh0 = jnp.concatenate([ba0, bb0], axis=1)        # (1, 512)
    wh1 = _block_diag(wa1, wb1)                      # (512, 256)
    bh1 = jnp.concatenate([ba1, bb1], axis=1)        # (1, 256)
    wh2 = _block_diag(wa2, wb2)                      # (256, 4)
    bh2 = jnp.concatenate([ba2, bb2], axis=1)        # (1, 4)

    packed = [(w0, b0), (w1, b1), (w2, b2), (wh0, bh0), (wh1, bh1), (wh2, bh2)]
    # bf16 weights for the MXU, f32 biases for the f32 accumulator add.
    return [(w.astype(jnp.bfloat16), b.astype(jnp.float32)) for w, b in packed]


# ----------------------------------------------------------------------------
# Wrapper
# ----------------------------------------------------------------------------
def _round_up(n, m):
    return ((n + m - 1) // m) * m


def mpl1_forward(x, params, *, tile_b=256):
    """x: (B, 9) float32. params: 9 (w, b) pairs (trunk, head0, head1).

    Returns (t, d): (B, 3) tanh head and (B, 1) sigmoid head, float32.
    """
    B, in_features = x.shape
    out0 = params[5][0].shape[1]   # 3
    out1 = params[8][0].shape[1]   # 1
    out_w = out0 + out1

    packed = pack_params(params)

    # Tile the batch: multiple of 8 sublanes; 256 fills the v6e/v7x MXU and
    # keeps double-buffered tiles + intermediates far under even v5e's
    # 16 MiB scoped-VMEM / v7x's smaller budget.
    tb = min(tile_b, _round_up(max(B, 1), 8))
    B_pad = _round_up(B, tb)

    x_in = x.astype(jnp.bfloat16)
    if B_pad != B:
        x_in = jnp.pad(x_in, ((0, B_pad - B), (0, 0)))

    flat_args = [x_in]
    in_specs = [pl.BlockSpec((tb, in_features), lambda i: (i, 0))]
    for w, b in packed:
        flat_args += [w, b]
        # Full-array, grid-invariant blocks: DMA'd once, VMEM-resident.
        in_specs += [
            pl.BlockSpec(w.shape, lambda i: (0, 0)),
            pl.BlockSpec(b.shape, lambda i: (0, 0)),
        ]

    out = pl.pallas_call(
        mpl1_kernel,
        out_shape=jax.ShapeDtypeStruct((B_pad, out_w), jnp.float32),
        grid=(B_pad // tb,),
        in_specs=in_specs,
        out_specs=pl.BlockSpec((tb, out_w), lambda i: (i, 0)),
        compiler_params=pltpu.CompilerParams(
            dimension_semantics=("parallel",),
        ),
    )(*flat_args)

    out = out[:B]
    return out[:, :out0], out[:, out0:out0 + out1]


# ----------------------------------------------------------------------------
# Deterministic parameter init (mirrors nn.Linear default: U(-1/sqrt(fan_in), +))
# ----------------------------------------------------------------------------
def init_params(key):
    dims = [
        (9, 64), (64, 256), (256, 512),          # shared trunk
        (512, 256), (256, 128), (128, 3),        # head 0 (tanh)
        (512, 256), (256, 128), (128, 1),        # head 1 (sigmoid)
    ]
    params = []
    for i, (fan_in, fan_out) in enumerate(dims):
        kw, kb = jax.random.split(jax.random.fold_in(key, i))
        bound = 1.0 / jnp.sqrt(jnp.float32(fan_in))
        w = jax.random.uniform(kw, (fan_in, fan_out), jnp.float32, -bound, bound)
        b = jax.random.uniform(kb, (1, fan_out), jnp.float32, -bound, bound)
        params.append((w, b))
    return params


# ----------------------------------------------------------------------------
# Pure-JAX f32 reference (mirrors the PyTorch module exactly)
# ----------------------------------------------------------------------------
def mpl1_reference(x, params):
    def lin(h, w, b):
        return h @ w + b
    h = x
    for w, b in params[0:3]:
        h = jnp.maximum(lin(h, w, b), 0.0)
    t = h
    for w, b in params[3:5]:
        t = jnp.maximum(lin(t, w, b), 0.0)
    t = jnp.tanh(lin(t, *params[5]))
    d = h
    for w, b in params[6:8]:
        d = jnp.maximum(lin(d, w, b), 0.0)
    d = jax.nn.sigmoid(lin(d, *params[8]))
    return t, d


if __name__ == "__main__":
    key = jax.random.PRNGKey(0)
    pkey, xkey = jax.random.split(key)

    INPUT_SIZE = 9
    params = init_params(pkey)
    fwd = jax.jit(mpl1_forward)

    # Small-batch case (single tile).
    B = 8
    x = jax.random.normal(xkey, (B, INPUT_SIZE), jnp.float32)
    t, d = fwd(x, params)
    jax.block_until_ready((t, d))
    t_ref, d_ref = mpl1_reference(x, params)
    assert t.shape == (B, 3) and d.shape == (B, 1)
    # Tolerance relaxed for bf16 matmul operands (f32 accumulation).
    assert jnp.allclose(t, t_ref, atol=2e-2, rtol=2e-2)
    assert jnp.allclose(d, d_ref, atol=2e-2, rtol=2e-2)

    # Multi-tile case with batch padding (exercises the grid).
    B2 = 300
    x2 = jax.random.normal(jax.random.fold_in(xkey, 1), (B2, INPUT_SIZE), jnp.float32)
    t2, d2 = fwd(x2, params)
    jax.block_until_ready((t2, d2))
    t2_ref, d2_ref = mpl1_reference(x2, params)
    assert t2.shape == (B2, 3) and d2.shape == (B2, 1)
    assert jnp.allclose(t2, t2_ref, atol=2e-2, rtol=2e-2)
    assert jnp.allclose(d2, d2_ref, atol=2e-2, rtol=2e-2)

    print("KERNEL_OK")
</pallas_src>

<mosaic_0001>
module attributes {stable_mosaic.version = 11 : i64} {
  func.func @mpl1_kernel(%arg0: i32, %arg1: memref<8x9xbf16, #tpu.memory_space<vmem>>, %arg2: memref<9x64xbf16, #tpu.memory_space<vmem>>, %arg3: memref<1x64xf32, #tpu.memory_space<vmem>>, %arg4: memref<64x256xbf16, #tpu.memory_space<vmem>>, %arg5: memref<1x256xf32, #tpu.memory_space<vmem>>, %arg6: memref<256x512xbf16, #tpu.memory_space<vmem>>, %arg7: memref<1x512xf32, #tpu.memory_space<vmem>>, %arg8: memref<512x512xbf16, #tpu.memory_space<vmem>>, %arg9: memref<1x512xf32, #tpu.memory_space<vmem>>, %arg10: memref<512x256xbf16, #tpu.memory_space<vmem>>, %arg11: memref<1x256xf32, #tpu.memory_space<vmem>>, %arg12: memref<256x4xbf16, #tpu.memory_space<vmem>>, %arg13: memref<1x4xf32, #tpu.memory_space<vmem>>, %arg14: memref<8x4xf32, #tpu.memory_space<vmem>>) attributes {dimension_semantics = [#tpu.dimension_semantics<parallel>], iteration_bounds = array<i64: 1>, scalar_prefetch = 0 : i64, scratch_operands = 0 : i64, tpu.core_type = #tpu.core_type<tc>, window_params = [{transform_indices = @transform_0, window_bounds = array<i64: 8, 9>}, {pipeline_mode = #tpu.pipeline_mode<synchronous>, transform_indices = @transform_1, window_bounds = array<i64: 9, 64>}, {pipeline_mode = #tpu.pipeline_mode<synchronous>, transform_indices = @transform_2, window_bounds = array<i64: 1, 64>}, {pipeline_mode = #tpu.pipeline_mode<synchronous>, transform_indices = @transform_3, window_bounds = array<i64: 64, 256>}, {pipeline_mode = #tpu.pipeline_mode<synchronous>, transform_indices = @transform_4, window_bounds = array<i64: 1, 256>}, {pipeline_mode = #tpu.pipeline_mode<synchronous>, transform_indices = @transform_5, window_bounds = array<i64: 256, 512>}, {pipeline_mode = #tpu.pipeline_mode<synchronous>, transform_indices = @transform_6, window_bounds = array<i64: 1, 512>}, {pipeline_mode = #tpu.pipeline_mode<synchronous>, transform_indices = @transform_7, window_bounds = array<i64: 512, 512>}, {pipeline_mode = #tpu.pipeline_mode<synchronous>, transform_indices = @transform_8, window_bounds = array<i64: 1, 512>}, {pipeline_mode = #tpu.pipeline_mode<synchronous>, transform_indices = @transform_9, window_bounds = array<i64: 512, 256>}, {pipeline_mode = #tpu.pipeline_mode<synchronous>, transform_indices = @transform_10, window_bounds = array<i64: 1, 256>}, {pipeline_mode = #tpu.pipeline_mode<synchronous>, transform_indices = @transform_11, window_bounds = array<i64: 256, 4>}, {pipeline_mode = #tpu.pipeline_mode<synchronous>, transform_indices = @transform_12, window_bounds = array<i64: 1, 4>}, {transform_indices = @transform_13, window_bounds = array<i64: 8, 4>}]} {
    %c0 = arith.constant 0 : index
    %c0_0 = arith.constant 0 : index
    %0 = vector.load %arg1[%c0, %c0_0] : memref<8x9xbf16, #tpu.memory_space<vmem>>, vector<8x9xbf16>
    %c0_1 = arith.constant 0 : index
    %c0_2 = arith.constant 0 : index
    %1 = vector.load %arg2[%c0_1, %c0_2] : memref<9x64xbf16, #tpu.memory_space<vmem>>, vector<9x64xbf16>
    %cst = arith.constant dense<0.000000e+00> : vector<8x64xf32>
    %2 = tpu.matmul %0, %1, %cst {dimension_numbers = #tpu.dot_dimension_numbers<[1], [0], [0], [1], [0, 0, 1, 1], [], []>} : vector<8x9xbf16>, vector<9x64xbf16>, vector<8x64xf32> -> vector<8x64xf32>
    %c0_3 = arith.constant 0 : index
    %c0_4 = arith.constant 0 : index
    %3 = vector.load %arg3[%c0_3, %c0_4] : memref<1x64xf32, #tpu.memory_space<vmem>>, vector<1x64xf32>
    %4 = vector.broadcast %3 : vector<1x64xf32> to vector<8x64xf32>
    %5 = arith.addf %2, %4 : vector<8x64xf32>
    %cst_5 = arith.constant 0.000000e+00 : f32
    %6 = vector.broadcast %cst_5 : f32 to vector<8x64xf32>
    %7 = arith.maximumf %5, %6 : vector<8x64xf32>
    %8 = arith.truncf %7 : vector<8x64xf32> to vector<8x64xbf16>
    %c0_6 = arith.constant 0 : index
    %c0_7 = arith.constant 0 : index
    %9 = vector.load %arg4[%c0_6, %c0_7] : memref<64x256xbf16, #tpu.memory_space<vmem>>, vector<64x256xbf16>
    %cst_8 = arith.constant dense<0.000000e+00> : vector<8x256xf32>
    %10 = tpu.matmul %8, %9, %cst_8 {dimension_numbers = #tpu.dot_dimension_numbers<[1], [0], [0], [1], [0, 0, 1, 1], [], []>} : vector<8x64xbf16>, vector<64x256xbf16>, vector<8x256xf32> -> vector<8x256xf32>
    %c0_9 = arith.constant 0 : index
    %c0_10 = arith.constant 0 : index
    %11 = vector.load %arg5[%c0_9, %c0_10] : memref<1x256xf32, #tpu.memory_space<vmem>>, vector<1x256xf32>
    %12 = vector.broadcast %11 : vector<1x256xf32> to vector<8x256xf32>
    %13 = arith.addf %10, %12 : vector<8x256xf32>
    %cst_11 = arith.constant 0.000000e+00 : f32
    %14 = vector.broadcast %cst_11 : f32 to vector<8x256xf32>
    %15 = arith.maximumf %13, %14 : vector<8x256xf32>
    %16 = arith.truncf %15 : vector<8x256xf32> to vector<8x256xbf16>
    %c0_12 = arith.constant 0 : index
    %c0_13 = arith.constant 0 : index
    %17 = vector.load %arg6[%c0_12, %c0_13] : memref<256x512xbf16, #tpu.memory_space<vmem>>, vector<256x512xbf16>
    %cst_14 = arith.constant dense<0.000000e+00> : vector<8x512xf32>
    %18 = tpu.matmul %16, %17, %cst_14 {dimension_numbers = #tpu.dot_dimension_numbers<[1], [0], [0], [1], [0, 0, 1, 1], [], []>} : vector<8x256xbf16>, vector<256x512xbf16>, vector<8x512xf32> -> vector<8x512xf32>
    %c0_15 = arith.constant 0 : index
    %c0_16 = arith.constant 0 : index
    %19 = vector.load %arg7[%c0_15, %c0_16] : memref<1x512xf32, #tpu.memory_space<vmem>>, vector<1x512xf32>
    %20 = vector.broadcast %19 : vector<1x512xf32> to vector<8x512xf32>
    %21 = arith.addf %18, %20 : vector<8x512xf32>
    %cst_17 = arith.constant 0.000000e+00 : f32
    %22 = vector.broadcast %cst_17 : f32 to vector<8x512xf32>
    %23 = arith.maximumf %21, %22 : vector<8x512xf32>
    %24 = arith.truncf %23 : vector<8x512xf32> to vector<8x512xbf16>
    %c0_18 = arith.constant 0 : index
    %c0_19 = arith.constant 0 : index
    %25 = vector.load %arg8[%c0_18, %c0_19] : memref<512x512xbf16, #tpu.memory_space<vmem>>, vector<512x512xbf16>
    %cst_20 = arith.constant dense<0.000000e+00> : vector<8x512xf32>
    %26 = tpu.matmul %24, %25, %cst_20 {dimension_numbers = #tpu.dot_dimension_numbers<[1], [0], [0], [1], [0, 0, 1, 1], [], []>} : vector<8x512xbf16>, vector<512x512xbf16>, vector<8x512xf32> -> vector<8x512xf32>
    %c0_21 = arith.constant 0 : index
    %c0_22 = arith.constant 0 : index
    %27 = vector.load %arg9[%c0_21, %c0_22] : memref<1x512xf32, #tpu.memory_space<vmem>>, vector<1x512xf32>
    %28 = vector.broadcast %27 : vector<1x512xf32> to vector<8x512xf32>
    %29 = arith.addf %26, %28 : vector<8x512xf32>
    %cst_23 = arith.constant 0.000000e+00 : f32
    %30 = vector.broadcast %cst_23 : f32 to vector<8x512xf32>
    %31 = arith.maximumf %29, %30 : vector<8x512xf32>
    %32 = arith.truncf %31 : vector<8x512xf32> to vector<8x512xbf16>
    %c0_24 = arith.constant 0 : index
    %c0_25 = arith.constant 0 : index
    %33 = vector.load %arg10[%c0_24, %c0_25] : memref<512x256xbf16, #tpu.memory_space<vmem>>, vector<512x256xbf16>
    %cst_26 = arith.constant dense<0.000000e+00> : vector<8x256xf32>
    %34 = tpu.matmul %32, %33, %cst_26 {dimension_numbers = #tpu.dot_dimension_numbers<[1], [0], [0], [1], [0, 0, 1, 1], [], []>} : vector<8x512xbf16>, vector<512x256xbf16>, vector<8x256xf32> -> vector<8x256xf32>
    %c0_27 = arith.constant 0 : index
    %c0_28 = arith.constant 0 : index
    %35 = vector.load %arg11[%c0_27, %c0_28] : memref<1x256xf32, #tpu.memory_space<vmem>>, vector<1x256xf32>
    %36 = vector.broadcast %35 : vector<1x256xf32> to vector<8x256xf32>
    %37 = arith.addf %34, %36 : vector<8x256xf32>
    %cst_29 = arith.constant 0.000000e+00 : f32
    %38 = vector.broadcast %cst_29 : f32 to vector<8x256xf32>
    %39 = arith.maximumf %37, %38 : vector<8x256xf32>
    %40 = arith.truncf %39 : vector<8x256xf32> to vector<8x256xbf16>
    %c0_30 = arith.constant 0 : index
    %c0_31 = arith.constant 0 : index
    %41 = vector.load %arg12[%c0_30, %c0_31] : memref<256x4xbf16, #tpu.memory_space<vmem>>, vector<256x4xbf16>
    %cst_32 = arith.constant dense<0.000000e+00> : vector<8x4xf32>
    %42 = tpu.matmul %40, %41, %cst_32 {dimension_numbers = #tpu.dot_dimension_numbers<[1], [0], [0], [1], [0, 0, 1, 1], [], []>} : vector<8x256xbf16>, vector<256x4xbf16>, vector<8x4xf32> -> vector<8x4xf32>
    %c0_33 = arith.constant 0 : index
    %c0_34 = arith.constant 0 : index
    %43 = vector.load %arg13[%c0_33, %c0_34] : memref<1x4xf32, #tpu.memory_space<vmem>>, vector<1x4xf32>
    %44 = vector.broadcast %43 : vector<1x4xf32> to vector<8x4xf32>
    %45 = arith.addf %42, %44 : vector<8x4xf32>
    %46 = tpu.iota {dimensions = array<i32: 1>} : vector<8x4xi32>
    %c3_i32 = arith.constant 3 : i32
    %47 = vector.broadcast %c3_i32 : i32 to vector<8x4xi32>
    %48 = arith.cmpi slt, %46, %47 : vector<8x4xi32>
    %49 = math.tanh %45 : vector<8x4xf32>
    %50 = arith.negf %45 : vector<8x4xf32>
    %51 = math.exp %50 : vector<8x4xf32>
    %cst_35 = arith.constant 1.000000e+00 : f32
    %52 = vector.broadcast %cst_35 : f32 to vector<8x4xf32>
    %53 = arith.addf %52, %51 : vector<8x4xf32>
    %54 = arith.divf %52, %53 : vector<8x4xf32>
    %55 = arith.select %48, %49, %54 : vector<8x4xi1>, vector<8x4xf32>
    %c0_36 = arith.constant 0 : index
    %c0_37 = arith.constant 0 : index
    %56 = vector.load %arg14[%c0_36, %c0_37] : memref<8x4xf32, #tpu.memory_space<vmem>>, vector<8x4xf32>
    tpu.vector_store %arg14[%c0_36, %c0_37], %55 {strides = array<i32>} : memref<8x4xf32, #tpu.memory_space<vmem>>, vector<8x4xf32>,
    return
  }
  func.func @transform_0(%arg0: i32) -> (i32, i32) {
    %c0_i32 = arith.constant 0 : i32
    %c0_i32_0 = arith.constant 0 : i32
    return %arg0, %c0_i32 : i32, i32
  }
  func.func @transform_1(%arg0: i32) -> (i32, i32) {
    %c0_i32 = arith.constant 0 : i32
    %c0_i32_0 = arith.constant 0 : i32
    %c0_i32_1 = arith.constant 0 : i32
    return %c0_i32, %c0_i32_0 : i32, i32
  }
  func.func @transform_2(%arg0: i32) -> (i32, i32) {
    %c0_i32 = arith.constant 0 : i32
    %c0_i32_0 = arith.constant 0 : i32
    %c0_i32_1 = arith.constant 0 : i32
    return %c0_i32, %c0_i32_0 : i32, i32
  }
  func.func @transform_3(%arg0: i32) -> (i32, i32) {
    %c0_i32 = arith.constant 0 : i32
    %c0_i32_0 = arith.constant 0 : i32
    %c0_i32_1 = arith.constant 0 : i32
    return %c0_i32, %c0_i32_0 : i32, i32
  }
  func.func @transform_4(%arg0: i32) -> (i32, i32) {
    %c0_i32 = arith.constant 0 : i32
    %c0_i32_0 = arith.constant 0 : i32
    %c0_i32_1 = arith.constant 0 : i32
    return %c0_i32, %c0_i32_0 : i32, i32
  }
  func.func @transform_5(%arg0: i32) -> (i32, i32) {
    %c0_i32 = arith.constant 0 : i32
    %c0_i32_0 = arith.constant 0 : i32
    %c0_i32_1 = arith.constant 0 : i32
    return %c0_i32, %c0_i32_0 : i32, i32
  }
  func.func @transform_6(%arg0: i32) -> (i32, i32) {
    %c0_i32 = arith.constant 0 : i32
    %c0_i32_0 = arith.constant 0 : i32
    %c0_i32_1 = arith.constant 0 : i32
    return %c0_i32, %c0_i32_0 : i32, i32
  }
  func.func @transform_7(%arg0: i32) -> (i32, i32) {
    %c0_i32 = arith.constant 0 : i32
    %c0_i32_0 = arith.constant 0 : i32
    %c0_i32_1 = arith.constant 0 : i32
    return %c0_i32, %c0_i32_0 : i32, i32
  }
  func.func @transform_8(%arg0: i32) -> (i32, i32) {
    %c0_i32 = arith.constant 0 : i32
    %c0_i32_0 = arith.constant 0 : i32
    %c0_i32_1 = arith.constant 0 : i32
    return %c0_i32, %c0_i32_0 : i32, i32
  }
  func.func @transform_9(%arg0: i32) -> (i32, i32) {
    %c0_i32 = arith.constant 0 : i32
    %c0_i32_0 = arith.constant 0 : i32
    %c0_i32_1 = arith.constant 0 : i32
    return %c0_i32, %c0_i32_0 : i32, i32
  }
  func.func @transform_10(%arg0: i32) -> (i32, i32) {
    %c0_i32 = arith.constant 0 : i32
    %c0_i32_0 = arith.constant 0 : i32
    %c0_i32_1 = arith.constant 0 : i32
    return %c0_i32, %c0_i32_0 : i32, i32
  }
  func.func @transform_11(%arg0: i32) -> (i32, i32) {
    %c0_i32 = arith.constant 0 : i32
    %c0_i32_0 = arith.constant 0 : i32
    %c0_i32_1 = arith.constant 0 : i32
    return %c0_i32, %c0_i32_0 : i32, i32
  }
  func.func @transform_12(%arg0: i32) -> (i32, i32) {
    %c0_i32 = arith.constant 0 : i32
    %c0_i32_0 = arith.constant 0 : i32
    %c0_i32_1 = arith.constant 0 : i32
    return %c0_i32, %c0_i32_0 : i32, i32
  }
  func.func @transform_13(%arg0: i32) -> (i32, i32) {
    %c0_i32 = arith.constant 0 : i32
    %c0_i32_0 = arith.constant 0 : i32
    return %arg0, %c0_i32 : i32, i32
  }
}

</mosaic_0001>

<bundles_post_ra>
// kernel: mpl1_forward.1
= control target key start
LH: loop header
LB: loop body
LE: loop exit
PB: predicated region body
PF: predicated region fallthrough
CT: control target
= control target key end

     0   :  { %vm64_vm0 = vcmask 1043456   ;;  %vm65_vm1 = vcmask 1044480   ;;  %v3111_v0 = vmov 0.0   ;;  %v3112_v2 = vmov 65535   ;;  %s4099_s1 = inlined_call_operand.vmem [shape: bf16[9,64], index: 1, kind: input, shape index: {}]   ;;  %s4100_s3 = inlined_call_operand.vmem [shape: bf16[64,256], index: 3, kind: input, shape index: {}]   ;;  %s4101_s0 = inlined_call_operand.vmem [shape: bf16[8,9], index: 0, kind: input, shape index: {}]   ;;  %s4102_s5 = inlined_call_operand.vmem [shape: bf16[256,512], index: 5, kind: input, shape index: {}]   ;;  %s4103_s2 = inlined_call_operand.vmem [shape: f32[1,64], index: 2, kind: input, shape index: {}]   ;;  %s4104_s7 = inlined_call_operand.vmem [shape: bf16[512,512], index: 7, kind: input, shape index: {}]   ;;  %s4105_s4 = inlined_call_operand.vmem [shape: f32[1,256], index: 4, kind: input, shape index: {}]   ;;  %s4106_s9 = inlined_call_operand.vmem [shape: bf16[512,256], index: 9, kind: input, shape index: {}]   ;;  %s4107_s6 = inlined_call_operand.vmem [shape: f32[1,512], index: 6, kind: input, shape index: {}]   ;;  %s4108_s11 = inlined_call_operand.vmem [shape: bf16[256,4], index: 11, kind: input, shape index: {}]   ;;  %s4109_s8 = inlined_call_operand.vmem [shape: f32[1,512], index: 8, kind: input, shape index: {}]   ;;  %s4110_s10 = inlined_call_operand.vmem [shape: f32[1,256], index: 10, kind: input, shape index: {}]   ;;  %s4111_s12 = inlined_call_operand.vmem [shape: f32[1,4], index: 12, kind: input, shape index: {}]   ;;  %s4112_s13 = inlined_call_operand.vmem [shape: f32[8,4], index: 13, kind: output, shape index: {}]  }
   0x1   :  { %2664 = vmatprep.subr.bf16.mxu0 %v3111_v0  ;;  %v2692_v1 = vld [vmem:[%s4099_s1] sm:$0x1f]   ;;  %v66_v3 = vsel %vm64_vm0, 4294967295, %v3112_v2  ;;  %vm3113_vm2 = vmmov 0   ;;  %vm60_vm3 = vcmask 72704   ;;  %v3114_v15 = vmov 0  }
   0x2   :  { %v67_v4 = vsel %vm65_vm1, %v66_v3, 0  ;;  %2666 = vmatprep.mubr.msk.bf16.mxu0 %vm3113_vm2, %v3111_v0  ;;  %v2695_v5 = vld [vmem:[%s4100_s3 + $0x4] ss:$8 sps:$4 sm:$0xff]   ;;  %v45_v7 = vld [vmem:[%s4101_s0] sm:$0xf]  ;;  %vm173_vm4 = vcmask 523264  }
   0x3   :  { %v69_v6 = vand.u32 %v2692_v1, %v67_v4  ;;  %v2693_v8 = vld [vmem:[%s4100_s3] ss:$8 sps:$4 sm:$0xff]   ;;  %v2698_v9 = vld [vmem:[%s4100_s3 + $0x14] ss:$8 sps:$4 sm:$0xff]   ;;  %v2696_v10 = vld [vmem:[%s4100_s3 + $0x10] ss:$8 sps:$4 sm:$0xff]  }
   0x4   :  { %v2701_v11 = vld [vmem:[%s4100_s3 + $0x24] ss:$8 sps:$4 sm:$0xff]   ;;  %v2699_v12 = vld [vmem:[%s4100_s3 + $0x20] ss:$8 sps:$4 sm:$0xff]   ;;  %v2704_v13 = vld [vmem:[%s4100_s3 + $0x34] ss:$8 sps:$4 sm:$0xff]  }
   0x5   :  { %2665 = vmatpush3.bf16.msra.mxu0 %v69_v6  ;;  %v2702_v14 = vld [vmem:[%s4100_s3 + $0x30] ss:$8 sps:$4 sm:$0xff]   ;;  %v2705_v16 = vld [vmem:[%s4102_s5 + $0x4] ss:$16 sps:$4 sm:$0xff]   ;;  %v2354_v44 = vld [vmem:[%s4103_s2] ss:$0 sm:$0xff] }
   0x6   :  { %177 = vmatprep.subr.bf16.mxu0 %v2695_v5  ;;  %v2707_v17 = vld [vmem:[%s4102_s5] ss:$16 sps:$4 sm:$0xff]   ;;  %628 = vmatprep.subr.bf16.mxu1 %v2705_v16  ;;  %v2708_v18 = vld [vmem:[%s4102_s5 + $0x24] ss:$16 sps:$4 sm:$0xff]   ;;  %v2755_v56 = vld [vmem:[%s4102_s5 + $0xc] ss:$16 sps:$4 sm:$0xff]  }
   0x7   :  { %629 = vmatpush1.bf16.msra.mxu1 %v2707_v17  ;;  %v2710_v19 = vld [vmem:[%s4102_s5 + $0x20] ss:$16 sps:$4 sm:$0xff]   ;;  %v2711_v20 = vld [vmem:[%s4102_s5 + $0x44] ss:$16 sps:$4 sm:$0xff]   ;;  %vm2348_vm6 = vcmask 31744  }
   0x8   :  { %2667 = vmatmul.mubr.msk.bf16.vlgmr.msra.gmra.mrb[0].mxu0 %vm60_vm3, %v45_v7  ;;  %630 = vmatprep.subr.bf16.mxu1 %v2708_v18  ;;  %v2713_v21 = vld [vmem:[%s4102_s5 + $0x40] ss:$16 sps:$4 sm:$0xff]   ;;  %v2714_v22 = vld [vmem:[%s4102_s5 + $0x64] ss:$16 sps:$4 sm:$0xff]  }
   0x9   :  { %178 = vmatpush1.bf16.msra.mxu0 %v2693_v8  ;;  %209 = vmatprep.mubr.bf16.mxu0 %v3114_v15  ;;  %v2716_v23 = vld [vmem:[%s4102_s5 + $0x60] ss:$16 sps:$4 sm:$0xff]   ;;  %v2717_v24 = vld [vmem:[%s4102_s5 + $0x84] ss:$16 sps:$4 sm:$0xff]  }
   0xa   :  { %179 = vmatprep.subr.bf16.mxu0 %v2698_v9  ;;  %v2719_v25 = vld [vmem:[%s4102_s5 + $0x80] ss:$16 sps:$4 sm:$0xff]   ;;  %v2720_v26 = vld [vmem:[%s4102_s5 + $0xa4] ss:$16 sps:$4 sm:$0xff]  }
   0xb   :  { %631 = vmatpush1.bf16.msra.mxu1 %v2710_v19  ;;  %v2722_v27 = vld [vmem:[%s4102_s5 + $0xa0] ss:$16 sps:$4 sm:$0xff]   ;;  %v2723_v28 = vld [vmem:[%s4102_s5 + $0xc4] ss:$16 sps:$4 sm:$0xff]  }
   0xc   :  { %632 = vmatprep.subr.bf16.mxu1 %v2711_v20  ;;  %v2725_v29 = vld [vmem:[%s4102_s5 + $0xc0] ss:$16 sps:$4 sm:$0xff]   ;;  %v2726_v30 = vld [vmem:[%s4102_s5 + $0xe4] ss:$16 sps:$4 sm:$0xff]  }
   0xd   :  { %180 = vmatpush1.bf16.msra.mxu0 %v2696_v10  ;;  %v2728_v31 = vld [vmem:[%s4102_s5 + $0xe0] ss:$16 sps:$4 sm:$0xff]   ;;  %v2729_v32 = vld [vmem:[%s4102_s5 + $0x104] ss:$16 sps:$4 sm:$0xff]  }
   0xe   :  { %181 = vmatprep.subr.bf16.mxu0 %v2701_v11  ;;  %v2731_v33 = vld [vmem:[%s4102_s5 + $0x100] ss:$16 sps:$4 sm:$0xff]   ;;  %v2732_v34 = vld [vmem:[%s4102_s5 + $0x124] ss:$16 sps:$4 sm:$0xff]  }
   0xf   :  { %633 = vmatpush1.bf16.msra.mxu1 %v2713_v21  ;;  %v2734_v35 = vld [vmem:[%s4102_s5 + $0x120] ss:$16 sps:$4 sm:$0xff]   ;;  %v2735_v36 = vld [vmem:[%s4102_s5 + $0x144] ss:$16 sps:$4 sm:$0xff]  }
  0x10   :  { %634 = vmatprep.subr.bf16.mxu1 %v2714_v22  ;;  %v2737_v37 = vld [vmem:[%s4102_s5 + $0x140] ss:$16 sps:$4 sm:$0xff]   ;;  %v2738_v38 = vld [vmem:[%s4102_s5 + $0x164] ss:$16 sps:$4 sm:$0xff]  }
  0x11   :  { %182 = vmatpush1.bf16.msra.mxu0 %v2699_v12  ;;  %v2740_v39 = vld [vmem:[%s4102_s5 + $0x160] ss:$16 sps:$4 sm:$0xff]   ;;  %v2741_v40 = vld [vmem:[%s4102_s5 + $0x184] ss:$16 sps:$4 sm:$0xff]  }
  0x12   :  { %183 = vmatprep.subr.bf16.mxu0 %v2704_v13  ;;  %v2743_v41 = vld [vmem:[%s4102_s5 + $0x180] ss:$16 sps:$4 sm:$0xff]   ;;  %v2744_v42 = vld [vmem:[%s4102_s5 + $0x1a4] ss:$16 sps:$4 sm:$0xff]  }
  0x13   :  { %635 = vmatpush1.bf16.msra.mxu1 %v2716_v23  ;;  %v2746_v43 = vld [vmem:[%s4102_s5 + $0x1a0] ss:$16 sps:$4 sm:$0xff]   ;;  %v2747_v52 = vld [vmem:[%s4102_s5 + $0x1c4] ss:$16 sps:$4 sm:$0xff]  }
  0x14   :  { %636 = vmatprep.subr.bf16.mxu1 %v2717_v24  ;;  %v2749_v53 = vld [vmem:[%s4102_s5 + $0x1c0] ss:$16 sps:$4 sm:$0xff]   ;;  %v2750_v54 = vld [vmem:[%s4102_s5 + $0x1e4] ss:$16 sps:$4 sm:$0xff]  }
  0x15   :  { %184 = vmatpush1.bf16.msra.mxu0 %v2702_v14  ;;  %v2752_v55 = vld [vmem:[%s4102_s5 + $0x1e0] ss:$16 sps:$4 sm:$0xff]   ;;  %v2803_v58 = vld [vmem:[%s4104_s7 + $0x4] ss:$16 sps:$4 sm:$0xff]   ;;  %v123_v14 = vlaneseq }
  0x16   :  { %v2801_v57 = vld [vmem:[%s4104_s7] ss:$16 sps:$4 sm:$0xff]   ;;  %1508 = vmatprep.subr.bf16.mxu0 %v2803_v58  ;;  %v2809_v59 = vld [vmem:[%s4104_s7 + $0x24] ss:$16 sps:$4 sm:$0xff]   ;;  %v2783_v58 = vld [vmem:[%s4102_s5 + $0x148] ss:$16 sps:$4 sm:$0xff]  }
  0x17   :  { %637 = vmatpush1.bf16.msra.mxu1 %v2719_v25  ;;  %v2807_v60 = vld [vmem:[%s4104_s7 + $0x20] ss:$16 sps:$4 sm:$0xff]   ;;  %v2815_v61 = vld [vmem:[%s4104_s7 + $0x44] ss:$16 sps:$4 sm:$0xff]   ;;  %v3387_v17 = vshrl.u32 %v123_v14, 7 }
  0x18   :  { %638 = vmatprep.subr.bf16.mxu1 %v2720_v26  ;;  %v2813_v62 = vld [vmem:[%s4104_s7 + $0x40] ss:$16 sps:$4 sm:$0xff]   ;;  %v2821_v63 = vld [vmem:[%s4104_s7 + $0x64] ss:$16 sps:$4 sm:$0xff]  }
  0x19   :  { %v2819_v0 = vld [vmem:[%s4104_s7 + $0x60] ss:$16 sps:$4 sm:$0xff]   ;;  %v2827_v1 = vld [vmem:[%s4104_s7 + $0x84] ss:$16 sps:$4 sm:$0xff]   ;;  %v3396_v20 = vsub.s32 0, %v3387_v17  ;;  %v3402_v22 = vsub.s32 1, %v3387_v17 }
  0x1a   :  { %v2825_v2 = vld [vmem:[%s4104_s7 + $0x80] ss:$16 sps:$4 sm:$0xff]   ;;  %v2833_v3 = vld [vmem:[%s4104_s7 + $0xa4] ss:$16 sps:$4 sm:$0xff]  }
  0x1b   :  { %639 = vmatpush1.bf16.msra.mxu1 %v2722_v27  ;;  %v2831_v4 = vld [vmem:[%s4104_s7 + $0xa0] ss:$16 sps:$4 sm:$0xff]   ;;  %v2839_v5 = vld [vmem:[%s4104_s7 + $0xc4] ss:$16 sps:$4 sm:$0xff]  }
  0x1c   :  { %640 = vmatprep.subr.bf16.mxu1 %v2723_v28  ;;  %v2837_v6 = vld [vmem:[%s4104_s7 + $0xc0] ss:$16 sps:$4 sm:$0xff]   ;;  %v2845_v7 = vld [vmem:[%s4104_s7 + $0xe4] ss:$16 sps:$4 sm:$0xff]  }
  0x1d   :  { %v2843_v8 = vld [vmem:[%s4104_s7 + $0xe0] ss:$16 sps:$4 sm:$0xff]   ;;  %v2851_v9 = vld [vmem:[%s4104_s7 + $0x104] ss:$16 sps:$4 sm:$0xff]  }
  0x1e   :  { %v2849_v10 = vld [vmem:[%s4104_s7 + $0x100] ss:$16 sps:$4 sm:$0xff]   ;;  %v2857_v11 = vld [vmem:[%s4104_s7 + $0x124] ss:$16 sps:$4 sm:$0xff]  }
  0x1f   :  { %641 = vmatpush1.bf16.msra.mxu1 %v2725_v29  ;;  %v2855_v12 = vld [vmem:[%s4104_s7 + $0x120] ss:$16 sps:$4 sm:$0xff]   ;;  %v2863_v13 = vld [vmem:[%s4104_s7 + $0x144] ss:$16 sps:$4 sm:$0xff]  }
  0x20   :  { %642 = vmatprep.subr.bf16.mxu1 %v2726_v30  ;;  %v2861_v15 = vld [vmem:[%s4104_s7 + $0x140] ss:$16 sps:$4 sm:$0xff]   ;;  %v2869_v16 = vld [vmem:[%s4104_s7 + $0x164] ss:$16 sps:$4 sm:$0xff]  }
  0x21   :  { %v2867_v18 = vld [vmem:[%s4104_s7 + $0x160] ss:$16 sps:$4 sm:$0xff]   ;;  %v2875_v19 = vld [vmem:[%s4104_s7 + $0x184] ss:$16 sps:$4 sm:$0xff]  }
  0x22   :  { %v121_v21 = vld [vmem:[%s4105_s4] sm:$0x3]  ;;  %v2881_v24 = vld [vmem:[%s4104_s7 + $0x1a4] ss:$16 sps:$4 sm:$0xff]  }
  0x23   :  { %643 = vmatpush1.bf16.msra.mxu1 %v2728_v31  ;;  %v2873_v23 = vld [vmem:[%s4104_s7 + $0x180] ss:$16 sps:$4 sm:$0xff]   ;;  %v126_v26 = vrot.slane %v121_v21, %v3396_v20  ;;  %v130_v27 = vrot.slane %v121_v21, %v3402_v22  ;;  %v2887_v21 = vld [vmem:[%s4104_s7 + $0x1c4] ss:$16 sps:$4 sm:$0xff]  }
  0x24   :  { %644 = vmatprep.subr.bf16.mxu1 %v2729_v32  ;;  %v2879_v25 = vld [vmem:[%s4104_s7 + $0x1a0] ss:$16 sps:$4 sm:$0xff]  }
  0x27   :  { %645 = vmatpush1.bf16.msra.mxu1 %v2731_v33 }
  0x28   :  { %646 = vmatprep.subr.bf16.mxu1 %v2732_v34 }
  0x2b   :  { %647 = vmatpush1.bf16.msra.mxu1 %v2734_v35 }
  0x2c   :  { %648 = vmatprep.subr.bf16.mxu1 %v2735_v36  ;;  %v2753_v36 = vld [vmem:[%s4102_s5 + $0x8] ss:$16 sps:$4 sm:$0xff]  }
  0x2f   :  { %649 = vmatpush1.bf16.msra.mxu1 %v2737_v37 }
  0x30   :  { %650 = vmatprep.subr.bf16.mxu1 %v2738_v38 }
  0x33   :  { %651 = vmatpush1.bf16.msra.mxu1 %v2740_v39  ;;  %v2758_v39 = vld [vmem:[%s4102_s5 + $0x2c] ss:$16 sps:$4 sm:$0xff]  }
  0x34   :  { %652 = vmatprep.subr.bf16.mxu1 %v2741_v40  ;;  %v2756_v40 = vld [vmem:[%s4102_s5 + $0x28] ss:$16 sps:$4 sm:$0xff]  }
  0x37   :  { %653 = vmatpush1.bf16.msra.mxu1 %v2743_v41  ;;  %v2761_v41 = vld [vmem:[%s4102_s5 + $0x4c] ss:$16 sps:$4 sm:$0xff]  }
  0x38   :  { %654 = vmatprep.subr.bf16.mxu1 %v2744_v42  ;;  %v2759_v42 = vld [vmem:[%s4102_s5 + $0x48] ss:$16 sps:$4 sm:$0xff]  }
  0x3b   :  { %655 = vmatpush1.bf16.msra.mxu1 %v2746_v43  ;;  %v2764_v43 = vld [vmem:[%s4102_s5 + $0x6c] ss:$16 sps:$4 sm:$0xff]  }
  0x3c   :  { %656 = vmatprep.subr.bf16.mxu1 %v2747_v52  ;;  %v2774_v52 = vld [vmem:[%s4102_s5 + $0xe8] ss:$16 sps:$4 sm:$0xff]  }
  0x3f   :  { %657 = vmatpush1.bf16.msra.mxu1 %v2749_v53  ;;  %v2779_v53 = vld [vmem:[%s4102_s5 + $0x10c] ss:$16 sps:$4 sm:$0xff]  }
  0x40   :  { %658 = vmatprep.subr.bf16.mxu1 %v2750_v54  ;;  %v2777_v54 = vld [vmem:[%s4102_s5 + $0x108] ss:$16 sps:$4 sm:$0xff]  }
  0x43   :  { %659 = vmatpush1.bf16.msra.mxu1 %v2752_v55  ;;  %v2782_v55 = vld [vmem:[%s4102_s5 + $0x12c] ss:$16 sps:$4 sm:$0xff]  }
  0x44   :  { %669 = vmatprep.subr.bf16.mxu1 %v2755_v56  ;;  %v2780_v56 = vld [vmem:[%s4102_s5 + $0x128] ss:$16 sps:$4 sm:$0xff]  }
  0xdb   :  { %v105_v45 = vpop.f32.mrb[0].mxu0 }
  0xdc   :  { %v106_v46 = vadd.f32 %v2354_v44, %v105_v45  ;;  %v2668_v47 = vpop.f32.mrb[1].mxu0  ;;  %v2762_v44 = vld [vmem:[%s4102_s5 + $0x68] ss:$16 sps:$4 sm:$0xff]   ;;  %v2767_v45 = vld [vmem:[%s4102_s5 + $0x8c] ss:$16 sps:$4 sm:$0xff]  }
  0xdd   :  { %v108_v48 = vpop.f32.mrb[2].mxu0  ;;  %v2770_v47 = vld [vmem:[%s4102_s5 + $0xac] ss:$16 sps:$4 sm:$0xff]  }
  0xde   :  { %v111_v49 = vmax.f32 %v106_v46, 0.0  ;;  %v2669_v50 = vpop.f32.mrb[3].mxu0  ;;  %v2765_v46 = vld [vmem:[%s4102_s5 + $0x88] ss:$16 sps:$4 sm:$0xff]  }
  0xdf   :  { %v2768_v48 = vld [vmem:[%s4102_s5 + $0xa8] ss:$16 sps:$4 sm:$0xff]  }
  0xe0   :  { %v112_v51 = vpack.c.bf16 %v111_v49, %v111_v49  ;;  %v2773_v49 = vld [vmem:[%s4102_s5 + $0xcc] ss:$16 sps:$4 sm:$0xff]   ;;  %v2771_v50 = vld [vmem:[%s4102_s5 + $0xc8] ss:$16 sps:$4 sm:$0xff]  }
  0xe2   :  { %2365 = vmatmul.mubr.msk.bf16.vlgmr.msra.gmra.mrb[4].mxu0 %vm173_vm4, %v112_v51  ;;  %v2776_v51 = vld [vmem:[%s4102_s5 + $0xec] ss:$16 sps:$4 sm:$0xff]  }
  0xe3   :  { %1509 = vmatpush1.bf16.msra.mxu0 %v2801_v57  ;;  %v2785_v57 = vld [vmem:[%s4102_s5 + $0x14c] ss:$16 sps:$4 sm:$0xff]  }
  0xe4   :  { %1510 = vmatprep.subr.bf16.mxu0 %v2809_v59  ;;  %v2788_v59 = vld [vmem:[%s4102_s5 + $0x16c] ss:$16 sps:$4 sm:$0xff]  }
  0xe7   :  { %1511 = vmatpush1.bf16.msra.mxu0 %v2807_v60  ;;  %v2786_v60 = vld [vmem:[%s4102_s5 + $0x168] ss:$16 sps:$4 sm:$0xff]  }
  0xe8   :  { %1512 = vmatprep.subr.bf16.mxu0 %v2815_v61  ;;  %v2791_v61 = vld [vmem:[%s4102_s5 + $0x18c] ss:$16 sps:$4 sm:$0xff]  }
  0xeb   :  { %1513 = vmatpush1.bf16.msra.mxu0 %v2813_v62  ;;  %v2789_v62 = vld [vmem:[%s4102_s5 + $0x188] ss:$16 sps:$4 sm:$0xff]  }
  0xec   :  { %1514 = vmatprep.subr.bf16.mxu0 %v2821_v63  ;;  %v2794_v63 = vld [vmem:[%s4102_s5 + $0x1ac] ss:$16 sps:$4 sm:$0xff]  }
  0xef   :  { %1515 = vmatpush1.bf16.msra.mxu0 %v2819_v0  ;;  %v2792_v0 = vld [vmem:[%s4102_s5 + $0x1a8] ss:$16 sps:$4 sm:$0xff]  }
  0xf0   :  { %1516 = vmatprep.subr.bf16.mxu0 %v2827_v1  ;;  %v2797_v1 = vld [vmem:[%s4102_s5 + $0x1cc] ss:$16 sps:$4 sm:$0xff]  }
  0xf3   :  { %1517 = vmatpush1.bf16.msra.mxu0 %v2825_v2  ;;  %v2795_v2 = vld [vmem:[%s4102_s5 + $0x1c8] ss:$16 sps:$4 sm:$0xff]  }
  0xf4   :  { %1518 = vmatprep.subr.bf16.mxu0 %v2833_v3  ;;  %v2800_v3 = vld [vmem:[%s4102_s5 + $0x1ec] ss:$16 sps:$4 sm:$0xff]  }
  0xf7   :  { %1519 = vmatpush1.bf16.msra.mxu0 %v2831_v4  ;;  %v2798_v4 = vld [vmem:[%s4102_s5 + $0x1e8] ss:$16 sps:$4 sm:$0xff]  }
  0xf8   :  { %1520 = vmatprep.subr.bf16.mxu0 %v2839_v5  ;;  %v2806_v5 = vld [vmem:[%s4104_s7 + $0xc] ss:$16 sps:$4 sm:$0xff]  }
  0xfb   :  { %1521 = vmatpush1.bf16.msra.mxu0 %v2837_v6  ;;  %v2804_v6 = vld [vmem:[%s4104_s7 + $0x8] ss:$16 sps:$4 sm:$0xff]  }
  0xfc   :  { %1522 = vmatprep.subr.bf16.mxu0 %v2845_v7  ;;  %v2812_v7 = vld [vmem:[%s4104_s7 + $0x2c] ss:$16 sps:$4 sm:$0xff]  }
  0xff   :  { %1523 = vmatpush1.bf16.msra.mxu0 %v2843_v8  ;;  %v2810_v8 = vld [vmem:[%s4104_s7 + $0x28] ss:$16 sps:$4 sm:$0xff]  }
 0x100   :  { %1524 = vmatprep.subr.bf16.mxu0 %v2851_v9  ;;  %v2818_v9 = vld [vmem:[%s4104_s7 + $0x4c] ss:$16 sps:$4 sm:$0xff]  }
 0x103   :  { %1525 = vmatpush1.bf16.msra.mxu0 %v2849_v10  ;;  %v2816_v10 = vld [vmem:[%s4104_s7 + $0x48] ss:$16 sps:$4 sm:$0xff]  }
 0x104   :  { %1526 = vmatprep.subr.bf16.mxu0 %v2857_v11  ;;  %v2824_v11 = vld [vmem:[%s4104_s7 + $0x6c] ss:$16 sps:$4 sm:$0xff]  }
 0x107   :  { %1527 = vmatpush1.bf16.msra.mxu0 %v2855_v12  ;;  %v2822_v12 = vld [vmem:[%s4104_s7 + $0x68] ss:$16 sps:$4 sm:$0xff]  }
 0x108   :  { %1528 = vmatprep.subr.bf16.mxu0 %v2863_v13  ;;  %v2830_v13 = vld [vmem:[%s4104_s7 + $0x8c] ss:$16 sps:$4 sm:$0xff]  }
 0x10b   :  { %1529 = vmatpush1.bf16.msra.mxu0 %v2861_v15  ;;  %v2828_v15 = vld [vmem:[%s4104_s7 + $0x88] ss:$16 sps:$4 sm:$0xff]  }
 0x10c   :  { %1530 = vmatprep.subr.bf16.mxu0 %v2869_v16  ;;  %v2836_v16 = vld [vmem:[%s4104_s7 + $0xac] ss:$16 sps:$4 sm:$0xff]  }
 0x10f   :  { %1531 = vmatpush1.bf16.msra.mxu0 %v2867_v18  ;;  %v2834_v18 = vld [vmem:[%s4104_s7 + $0xa8] ss:$16 sps:$4 sm:$0xff]  }
 0x110   :  { %1532 = vmatprep.subr.bf16.mxu0 %v2875_v19  ;;  %v2842_v19 = vld [vmem:[%s4104_s7 + $0xcc] ss:$16 sps:$4 sm:$0xff]  }
 0x113   :  { %1533 = vmatpush1.bf16.msra.mxu0 %v2873_v23  ;;  %v2885_v23 = vld [vmem:[%s4104_s7 + $0x1c0] ss:$16 sps:$4 sm:$0xff]  }
 0x114   :  { %1534 = vmatprep.subr.bf16.mxu0 %v2881_v24  ;;  %v2840_v24 = vld [vmem:[%s4104_s7 + $0xc8] ss:$16 sps:$4 sm:$0xff]  }
 0x117   :  { %1535 = vmatpush1.bf16.msra.mxu0 %v2879_v25  ;;  %v2848_v25 = vld [vmem:[%s4104_s7 + $0xec] ss:$16 sps:$4 sm:$0xff]  }
 0x118   :  { %1536 = vmatprep.subr.bf16.mxu0 %v2887_v21  ;;  %v2935_v21 = vld [vmem:[%s4104_s7 + $0x2c4] ss:$16 sps:$4 sm:$0xff]  }
 0x11b   :  { %1537 = vmatpush1.bf16.msra.mxu0 %v2885_v23  ;;  %v2938_v23 = vld [vmem:[%s4104_s7 + $0x2cc] ss:$16 sps:$4 sm:$0xff]  }
 0x1b5   :  { %v211_v28 = vpop.f32.mrb[4].mxu0 }
 0x1b6   :  { %v212_v29 = vadd.f32 %v211_v28, %v126_v26  ;;  %v213_v30 = vpop.f32.mrb[5].mxu0  ;;  %v2893_v26 = vld [vmem:[%s4104_s7 + $0x1e4] ss:$16 sps:$4 sm:$0xff]   ;;  %v2846_v28 = vld [vmem:[%s4104_s7 + $0xe8] ss:$16 sps:$4 sm:$0xff]  }
 0x1b7   :  { %v214_v31 = vadd.f32 %v213_v30, %v130_v27  ;;  %v215_v32 = vpop.f32.mrb[6].mxu0  ;;  %v2891_v27 = vld [vmem:[%s4104_s7 + $0x1e0] ss:$16 sps:$4 sm:$0xff]   ;;  %1538 = vmatprep.subr.bf16.mxu0 %v2893_v26  ;;  %v2899_v30 = vld [vmem:[%s4104_s7 + $0x204] ss:$16 sps:$4 sm:$0xff]  }
 0x1b8   :  { %v218_v33 = vmax.f32 %v212_v29, 0.0  ;;  %v216_v34 = vpop.f32.mrb[7].mxu0  ;;  %1539 = vmatpush1.bf16.msra.mxu0 %v2891_v27  ;;  %v2854_v29 = vld [vmem:[%s4104_s7 + $0x10c] ss:$16 sps:$4 sm:$0xff]   ;;  %v2941_v26 = vld [vmem:[%s4104_s7 + $0x2e4] ss:$16 sps:$4 sm:$0xff]  }
 0x1b9   :  { %v219_v35 = vmax.f32 %v214_v31, 0.0  ;;  %1549 = vmatprep.subr.bf16.mxu0 %v2899_v30  ;;  %v2852_v31 = vld [vmem:[%s4104_s7 + $0x108] ss:$16 sps:$4 sm:$0xff]   ;;  %v2860_v32 = vld [vmem:[%s4104_s7 + $0x12c] ss:$16 sps:$4 sm:$0xff]  }
 0x1ba   :  { %v3418_v38 = vpack.c.bf16 %v218_v33, %v218_v33  ;;  %v2858_v33 = vld [vmem:[%s4104_s7 + $0x128] ss:$16 sps:$4 sm:$0xff]   ;;  %v2866_v34 = vld [vmem:[%s4104_s7 + $0x14c] ss:$16 sps:$4 sm:$0xff]   ;;  %v2947_v30 = vld [vmem:[%s4104_s7 + $0x304] ss:$16 sps:$4 sm:$0xff]  }
 0x1bb   :  { %v221_v37 = vpack.c.bf16 %v219_v35, %v219_v35  ;;  %v2864_v35 = vld [vmem:[%s4104_s7 + $0x148] ss:$16 sps:$4 sm:$0xff]   ;;  %v2944_v27 = vld [vmem:[%s4104_s7 + $0x2ec] ss:$16 sps:$4 sm:$0xff]  }
 0x1bd   :  { %660 = vmatprep.mubr.bf16.mxu1 %v221_v37 }
 0x1be   :  { %661 = vmatmul.mubr.bf16.vlgmr.msra.gmra.mrb[0].mxu1 %v3418_v38 }
 0x1bf   :  { %670 = vmatpush1.bf16.msra.mxu1 %v2753_v36  ;;  %701 = vmatprep.mubr.bf16.mxu1 %v221_v37  ;;  %v2872_v36 = vld [vmem:[%s4104_s7 + $0x16c] ss:$16 sps:$4 sm:$0xff]   ;;  %v2870_v37 = vld [vmem:[%s4104_s7 + $0x168] ss:$16 sps:$4 sm:$0xff]  }
 0x1c0   :  { %671 = vmatprep.subr.bf16.mxu1 %v2758_v39  ;;  %v2876_v39 = vld [vmem:[%s4104_s7 + $0x188] ss:$16 sps:$4 sm:$0xff]  }
 0x1c3   :  { %672 = vmatpush1.bf16.msra.mxu1 %v2756_v40  ;;  %v2884_v40 = vld [vmem:[%s4104_s7 + $0x1ac] ss:$16 sps:$4 sm:$0xff]  }
 0x1c4   :  { %673 = vmatprep.subr.bf16.mxu1 %v2761_v41  ;;  %v2882_v41 = vld [vmem:[%s4104_s7 + $0x1a8] ss:$16 sps:$4 sm:$0xff]  }
 0x1c7   :  { %674 = vmatpush1.bf16.msra.mxu1 %v2759_v42  ;;  %v2890_v42 = vld [vmem:[%s4104_s7 + $0x1cc] ss:$16 sps:$4 sm:$0xff]  }
 0x1c8   :  { %675 = vmatprep.subr.bf16.mxu1 %v2764_v43  ;;  %v2888_v43 = vld [vmem:[%s4104_s7 + $0x1c8] ss:$16 sps:$4 sm:$0xff]  }
 0x1cb   :  { %676 = vmatpush1.bf16.msra.mxu1 %v2762_v44  ;;  %v2896_v44 = vld [vmem:[%s4104_s7 + $0x1ec] ss:$16 sps:$4 sm:$0xff]  }
 0x1cc   :  { %677 = vmatprep.subr.bf16.mxu1 %v2767_v45  ;;  %v2894_v45 = vld [vmem:[%s4104_s7 + $0x1e8] ss:$16 sps:$4 sm:$0xff]  }
 0x1cf   :  { %678 = vmatpush1.bf16.msra.mxu1 %v2765_v46  ;;  %v2902_v46 = vld [vmem:[%s4104_s7 + $0x20c] ss:$16 sps:$4 sm:$0xff]  }
 0x1d0   :  { %679 = vmatprep.subr.bf16.mxu1 %v2770_v47  ;;  %v3629_v47 = vld [vmem:[%s4107_s6] sm:$0xf] }
 0x1d3   :  { %680 = vmatpush1.bf16.msra.mxu1 %v2768_v48  ;;  %v291_v48 = vrot.slane %v3629_v47, %v3396_v20 }
 0x1d4   :  { %681 = vmatprep.subr.bf16.mxu1 %v2773_v49  ;;  %v295_v49 = vrot.slane %v3629_v47, %v3402_v22 }
 0x1d7   :  { %682 = vmatpush1.bf16.msra.mxu1 %v2771_v50 }
 0x1d8   :  { %683 = vmatprep.subr.bf16.mxu1 %v2776_v51 }
 0x1db   :  { %684 = vmatpush1.bf16.msra.mxu1 %v2774_v52 }
 0x1dc   :  { %685 = vmatprep.subr.bf16.mxu1 %v2779_v53 }
 0x1df   :  { %686 = vmatpush1.bf16.msra.mxu1 %v2777_v54 }
 0x1e0   :  { %687 = vmatprep.subr.bf16.mxu1 %v2782_v55 }
 0x1e3   :  { %688 = vmatpush1.bf16.msra.mxu1 %v2780_v56 }
 0x1e4   :  { %689 = vmatprep.subr.bf16.mxu1 %v2785_v57 }
 0x1e7   :  { %690 = vmatpush1.bf16.msra.mxu1 %v2783_v58 }
 0x1e8   :  { %691 = vmatprep.subr.bf16.mxu1 %v2788_v59  ;;  %v2897_v59 = vld [vmem:[%s4104_s7 + $0x200] ss:$16 sps:$4 sm:$0xff]  }
 0x1eb   :  { %692 = vmatpush1.bf16.msra.mxu1 %v2786_v60  ;;  %v2900_v60 = vld [vmem:[%s4104_s7 + $0x208] ss:$16 sps:$4 sm:$0xff]  }
 0x1ec   :  { %693 = vmatprep.subr.bf16.mxu1 %v2791_v61 }
 0x1ef   :  { %694 = vmatpush1.bf16.msra.mxu1 %v2789_v62  ;;  %v2905_v62 = vld [vmem:[%s4104_s7 + $0x224] ss:$16 sps:$4 sm:$0xff]  }
 0x1f0   :  { %695 = vmatprep.subr.bf16.mxu1 %v2794_v63  ;;  %v2908_v63 = vld [vmem:[%s4104_s7 + $0x22c] ss:$16 sps:$4 sm:$0xff]  }
 0x1f3   :  { %696 = vmatpush1.bf16.msra.mxu1 %v2792_v0  ;;  %v2903_v0 = vld [vmem:[%s4104_s7 + $0x220] ss:$16 sps:$4 sm:$0xff]  }
 0x1f4   :  { %697 = vmatprep.subr.bf16.mxu1 %v2797_v1  ;;  %v2906_v1 = vld [vmem:[%s4104_s7 + $0x228] ss:$16 sps:$4 sm:$0xff]  }
 0x1f7   :  { %698 = vmatpush1.bf16.msra.mxu1 %v2795_v2  ;;  %v2911_v2 = vld [vmem:[%s4104_s7 + $0x244] ss:$16 sps:$4 sm:$0xff]  }
 0x1f8   :  { %699 = vmatprep.subr.bf16.mxu1 %v2800_v3  ;;  %v2914_v3 = vld [vmem:[%s4104_s7 + $0x24c] ss:$16 sps:$4 sm:$0xff]  }
 0x1fb   :  { %700 = vmatpush1.bf16.msra.mxu1 %v2798_v4  ;;  %v2909_v4 = vld [vmem:[%s4104_s7 + $0x240] ss:$16 sps:$4 sm:$0xff]  }
 0x1fc   :  { %1590 = vmatprep.subr.bf16.mxu1 %v2806_v5  ;;  %v2912_v5 = vld [vmem:[%s4104_s7 + $0x248] ss:$16 sps:$4 sm:$0xff]  }
 0x1fe   :  { %702 = vmatmul.mubr.bf16.vlgmr.msra.gmra.mrb[4].mxu1 %v3418_v38  ;;  %v2878_v38 = vld [vmem:[%s4104_s7 + $0x18c] ss:$16 sps:$4 sm:$0xff]  }
 0x1ff   :  { %1591 = vmatpush1.bf16.msra.mxu1 %v2804_v6  ;;  %v2917_v6 = vld [vmem:[%s4104_s7 + $0x264] ss:$16 sps:$4 sm:$0xff]  }
 0x200   :  { %1592 = vmatprep.subr.bf16.mxu1 %v2812_v7  ;;  %v2920_v7 = vld [vmem:[%s4104_s7 + $0x26c] ss:$16 sps:$4 sm:$0xff]  }
 0x203   :  { %1593 = vmatpush1.bf16.msra.mxu1 %v2810_v8  ;;  %v2915_v8 = vld [vmem:[%s4104_s7 + $0x260] ss:$16 sps:$4 sm:$0xff]  }
 0x204   :  { %1594 = vmatprep.subr.bf16.mxu1 %v2818_v9  ;;  %v2918_v9 = vld [vmem:[%s4104_s7 + $0x268] ss:$16 sps:$4 sm:$0xff]  }
 0x207   :  { %1595 = vmatpush1.bf16.msra.mxu1 %v2816_v10  ;;  %v2923_v10 = vld [vmem:[%s4104_s7 + $0x284] ss:$16 sps:$4 sm:$0xff]  }
 0x208   :  { %1596 = vmatprep.subr.bf16.mxu1 %v2824_v11  ;;  %v2926_v11 = vld [vmem:[%s4104_s7 + $0x28c] ss:$16 sps:$4 sm:$0xff]  }
 0x20b   :  { %1597 = vmatpush1.bf16.msra.mxu1 %v2822_v12  ;;  %v2921_v12 = vld [vmem:[%s4104_s7 + $0x280] ss:$16 sps:$4 sm:$0xff]  }
 0x20c   :  { %1598 = vmatprep.subr.bf16.mxu1 %v2830_v13  ;;  %v2924_v13 = vld [vmem:[%s4104_s7 + $0x288] ss:$16 sps:$4 sm:$0xff]  }
 0x20f   :  { %1599 = vmatpush1.bf16.msra.mxu1 %v2828_v15  ;;  %v2929_v15 = vld [vmem:[%s4104_s7 + $0x2a4] ss:$16 sps:$4 sm:$0xff]  }
 0x210   :  { %1600 = vmatprep.subr.bf16.mxu1 %v2836_v16  ;;  %v2932_v16 = vld [vmem:[%s4104_s7 + $0x2ac] ss:$16 sps:$4 sm:$0xff]  }
 0x213   :  { %1601 = vmatpush1.bf16.msra.mxu1 %v2834_v18  ;;  %v2927_v18 = vld [vmem:[%s4104_s7 + $0x2a0] ss:$16 sps:$4 sm:$0xff]  }
 0x214   :  { %1602 = vmatprep.subr.bf16.mxu1 %v2842_v19  ;;  %v2930_v19 = vld [vmem:[%s4104_s7 + $0x2a8] ss:$16 sps:$4 sm:$0xff]  }
 0x217   :  { %1603 = vmatpush1.bf16.msra.mxu1 %v2840_v24  ;;  %v2933_v24 = vld [vmem:[%s4104_s7 + $0x2c0] ss:$16 sps:$4 sm:$0xff]  }
 0x218   :  { %1604 = vmatprep.subr.bf16.mxu1 %v2848_v25  ;;  %v2936_v25 = vld [vmem:[%s4104_s7 + $0x2c8] ss:$16 sps:$4 sm:$0xff]  }
 0x21b   :  { %1605 = vmatpush1.bf16.msra.mxu1 %v2846_v28  ;;  %v2939_v28 = vld [vmem:[%s4104_s7 + $0x2e0] ss:$16 sps:$4 sm:$0xff]  }
 0x21c   :  { %1606 = vmatprep.subr.bf16.mxu1 %v2854_v29  ;;  %v2942_v29 = vld [vmem:[%s4104_s7 + $0x2e8] ss:$16 sps:$4 sm:$0xff]  }
 0x21f   :  { %1607 = vmatpush1.bf16.msra.mxu1 %v2852_v31  ;;  %v2950_v31 = vld [vmem:[%s4104_s7 + $0x30c] ss:$16 sps:$4 sm:$0xff]  }
 0x220   :  { %1608 = vmatprep.subr.bf16.mxu1 %v2860_v32  ;;  %v2945_v32 = vld [vmem:[%s4104_s7 + $0x300] ss:$16 sps:$4 sm:$0xff]  }
 0x223   :  { %1609 = vmatpush1.bf16.msra.mxu1 %v2858_v33  ;;  %v2948_v33 = vld [vmem:[%s4104_s7 + $0x308] ss:$16 sps:$4 sm:$0xff]  }
 0x224   :  { %1610 = vmatprep.subr.bf16.mxu1 %v2866_v34  ;;  %v2953_v34 = vld [vmem:[%s4104_s7 + $0x324] ss:$16 sps:$4 sm:$0xff]  }
 0x227   :  { %1611 = vmatpush1.bf16.msra.mxu1 %v2864_v35  ;;  %v2956_v35 = vld [vmem:[%s4104_s7 + $0x32c] ss:$16 sps:$4 sm:$0xff]  }
 0x228   :  { %1612 = vmatprep.subr.bf16.mxu1 %v2872_v36  ;;  %v2951_v36 = vld [vmem:[%s4104_s7 + $0x320] ss:$16 sps:$4 sm:$0xff]  }
 0x22b   :  { %1613 = vmatpush1.bf16.msra.mxu1 %v2870_v37  ;;  %v2954_v37 = vld [vmem:[%s4104_s7 + $0x328] ss:$16 sps:$4 sm:$0xff]  }
 0x22c   :  { %1614 = vmatprep.subr.bf16.mxu1 %v2878_v38  ;;  %v2959_v38 = vld [vmem:[%s4104_s7 + $0x344] ss:$16 sps:$4 sm:$0xff]  }
 0x22f   :  { %1615 = vmatpush1.bf16.msra.mxu1 %v2876_v39  ;;  %v2962_v39 = vld [vmem:[%s4104_s7 + $0x34c] ss:$16 sps:$4 sm:$0xff]  }
 0x230   :  { %1616 = vmatprep.subr.bf16.mxu1 %v2884_v40  ;;  %v2957_v40 = vld [vmem:[%s4104_s7 + $0x340] ss:$16 sps:$4 sm:$0xff]  }
 0x233   :  { %1617 = vmatpush1.bf16.msra.mxu1 %v2882_v41  ;;  %v2960_v41 = vld [vmem:[%s4104_s7 + $0x348] ss:$16 sps:$4 sm:$0xff]  }
 0x234   :  { %1618 = vmatprep.subr.bf16.mxu1 %v2890_v42  ;;  %v2965_v42 = vld [vmem:[%s4104_s7 + $0x364] ss:$16 sps:$4 sm:$0xff]  }
 0x237   :  { %1619 = vmatpush1.bf16.msra.mxu1 %v2888_v43  ;;  %v2968_v43 = vld [vmem:[%s4104_s7 + $0x36c] ss:$16 sps:$4 sm:$0xff]  }
 0x238   :  { %1620 = vmatprep.subr.bf16.mxu1 %v2896_v44  ;;  %v2963_v44 = vld [vmem:[%s4104_s7 + $0x360] ss:$16 sps:$4 sm:$0xff]  }
 0x23b   :  { %1621 = vmatpush1.bf16.msra.mxu1 %v2894_v45  ;;  %v2966_v45 = vld [vmem:[%s4104_s7 + $0x368] ss:$16 sps:$4 sm:$0xff]  }
 0x23c   :  { %1631 = vmatprep.subr.bf16.mxu1 %v2902_v46  ;;  %v2971_v46 = vld [vmem:[%s4104_s7 + $0x384] ss:$16 sps:$4 sm:$0xff]  }
 0x291   :  { %v662_v50 = vpop.f32.mrb[0].mxu1 }
 0x292   :  { %v663_v51 = vadd.f32 %v662_v50, %v291_v48  ;;  %v664_v52 = vpop.f32.mrb[1].mxu1  ;;  %v2974_v48 = vld [vmem:[%s4104_s7 + $0x38c] ss:$16 sps:$4 sm:$0xff]   ;;  %v2972_v50 = vld [vmem:[%s4104_s7 + $0x388] ss:$16 sps:$4 sm:$0xff]  }
 0x293   :  { %v665_v53 = vadd.f32 %v664_v52, %v295_v49  ;;  %v666_v54 = vpop.f32.mrb[2].mxu1  ;;  %v2969_v49 = vld [vmem:[%s4104_s7 + $0x380] ss:$16 sps:$4 sm:$0xff]   ;;  %v2980_v52 = vld [vmem:[%s4104_s7 + $0x3ac] ss:$16 sps:$4 sm:$0xff]  }
 0x294   :  { %v710_v55 = vmax.f32 %v663_v51, 0.0  ;;  %v667_v56 = vpop.f32.mrb[3].mxu1  ;;  %v2977_v51 = vld [vmem:[%s4104_s7 + $0x3a4] ss:$16 sps:$4 sm:$0xff]   ;;  %v2975_v54 = vld [vmem:[%s4104_s7 + $0x3a0] ss:$16 sps:$4 sm:$0xff]  }
 0x295   :  { %v711_v57 = vmax.f32 %v665_v53, 0.0  ;;  %v298_v53 = vsub.s32 2, %v3387_v17  ;;  %v302_v56 = vsub.s32 3, %v3387_v17  ;;  %v3086_v17 = vld [vmem:[%s4106_s9 + $0x1f0] ss:$8 sps:$4 sm:$0xff]  }
 0x296   :  { %v714_v61 = vpack.c.bf16 %v710_v55, %v710_v55  ;;  %v2978_v55 = vld [vmem:[%s4104_s7 + $0x3a8] ss:$16 sps:$4 sm:$0xff]  }
 0x297   :  { %v715_v58 = vpack.c.bf16 %v711_v57, %v711_v57  ;;  %v2983_v57 = vld [vmem:[%s4104_s7 + $0x3c4] ss:$16 sps:$4 sm:$0xff]  }
 0x299   :  { %1540 = vmatprep.mubr.bf16.mxu0 %v715_v58  ;;  %1622 = vmatprep.mubr.bf16.mxu1 %v715_v58  ;;  %v2986_v58 = vld [vmem:[%s4104_s7 + $0x3cc] ss:$16 sps:$4 sm:$0xff]  }
 0x29a   :  { %1541 = vmatmul.mubr.bf16.vlgmr.msra.gmra.mrb[8].mxu0 %v714_v61  ;;  %1623 = vmatmul.mubr.bf16.vlgmr.msra.gmra.mrb[8].mxu1 %v714_v61  ;;  %v2981_v61 = vld [vmem:[%s4104_s7 + $0x3c0] ss:$16 sps:$4 sm:$0xff]  }
 0x29b   :  { %1550 = vmatpush1.bf16.msra.mxu0 %v2897_v59  ;;  %1632 = vmatpush1.bf16.msra.mxu1 %v2900_v60  ;;  %v299_v59 = vrot.slane %v3629_v47, %v298_v53  ;;  %v303_v60 = vrot.slane %v3629_v47, %v302_v56 }
 0x29c   :  { %1551 = vmatprep.subr.bf16.mxu0 %v2905_v62  ;;  %1633 = vmatprep.subr.bf16.mxu1 %v2908_v63  ;;  %v2984_v62 = vld [vmem:[%s4104_s7 + $0x3c8] ss:$16 sps:$4 sm:$0xff]   ;;  %v2989_v63 = vld [vmem:[%s4104_s7 + $0x3e4] ss:$16 sps:$4 sm:$0xff]  }
 0x29f   :  { %1552 = vmatpush1.bf16.msra.mxu0 %v2903_v0  ;;  %1634 = vmatpush1.bf16.msra.mxu1 %v2906_v1  ;;  %v2992_v0 = vld [vmem:[%s4104_s7 + $0x3ec] ss:$16 sps:$4 sm:$0xff]  }
 0x2a0   :  { %1553 = vmatprep.subr.bf16.mxu0 %v2911_v2  ;;  %1635 = vmatprep.subr.bf16.mxu1 %v2914_v3 }
 0x2a3   :  { %1554 = vmatpush1.bf16.msra.mxu0 %v2909_v4  ;;  %1636 = vmatpush1.bf16.msra.mxu1 %v2912_v5  ;;  %v2987_v5 = vld [vmem:[%s4104_s7 + $0x3e0] ss:$16 sps:$4 sm:$0xff]  }
 0x2a4   :  { %1555 = vmatprep.subr.bf16.mxu0 %v2917_v6  ;;  %1637 = vmatprep.subr.bf16.mxu1 %v2920_v7  ;;  %v2990_v6 = vld [vmem:[%s4104_s7 + $0x3e8] ss:$16 sps:$4 sm:$0xff]  }
 0x2a7   :  { %1556 = vmatpush1.bf16.msra.mxu0 %v2915_v8  ;;  %1638 = vmatpush1.bf16.msra.mxu1 %v2918_v9  ;;  %v2995_v9 = vld [vmem:[%s4106_s9 + $0x4] ss:$8 sps:$4 sm:$0xff]  }
 0x2a8   :  { %1557 = vmatprep.subr.bf16.mxu0 %v2923_v10  ;;  %1639 = vmatprep.subr.bf16.mxu1 %v2926_v11 }
 0x2ab   :  { %1558 = vmatpush1.bf16.msra.mxu0 %v2921_v12  ;;  %1640 = vmatpush1.bf16.msra.mxu1 %v2924_v13  ;;  %v2993_v12 = vld [vmem:[%s4106_s9] ss:$8 sps:$4 sm:$0xff]  }
 0x2ac   :  { %1559 = vmatprep.subr.bf16.mxu0 %v2929_v15  ;;  %1641 = vmatprep.subr.bf16.mxu1 %v2932_v16  ;;  %v2998_v15 = vld [vmem:[%s4106_s9 + $0x14] ss:$8 sps:$4 sm:$0xff]   ;;  %v2996_v16 = vld [vmem:[%s4106_s9 + $0x10] ss:$8 sps:$4 sm:$0xff]  }
 0x2af   :  { %1560 = vmatpush1.bf16.msra.mxu0 %v2927_v18  ;;  %1642 = vmatpush1.bf16.msra.mxu1 %v2930_v19  ;;  %v3001_v18 = vld [vmem:[%s4106_s9 + $0x24] ss:$8 sps:$4 sm:$0xff]   ;;  %v2999_v19 = vld [vmem:[%s4106_s9 + $0x20] ss:$8 sps:$4 sm:$0xff]  }
 0x2b0   :  { %1561 = vmatprep.subr.bf16.mxu0 %v2935_v21  ;;  %1643 = vmatprep.subr.bf16.mxu1 %v2938_v23  ;;  %v3004_v21 = vld [vmem:[%s4106_s9 + $0x34] ss:$8 sps:$4 sm:$0xff]   ;;  %v3002_v23 = vld [vmem:[%s4106_s9 + $0x30] ss:$8 sps:$4 sm:$0xff]  }
 0x2b3   :  { %1562 = vmatpush1.bf16.msra.mxu0 %v2933_v24  ;;  %1644 = vmatpush1.bf16.msra.mxu1 %v2936_v25  ;;  %v3007_v24 = vld [vmem:[%s4106_s9 + $0x44] ss:$8 sps:$4 sm:$0xff]   ;;  %v3005_v25 = vld [vmem:[%s4106_s9 + $0x40] ss:$8 sps:$4 sm:$0xff]  }
 0x2b4   :  { %1563 = vmatprep.subr.bf16.mxu0 %v2941_v26  ;;  %1645 = vmatprep.subr.bf16.mxu1 %v2944_v27  ;;  %v3010_v26 = vld [vmem:[%s4106_s9 + $0x54] ss:$8 sps:$4 sm:$0xff]   ;;  %v3008_v27 = vld [vmem:[%s4106_s9 + $0x50] ss:$8 sps:$4 sm:$0xff]  }
 0x2b7   :  { %1564 = vmatpush1.bf16.msra.mxu0 %v2939_v28  ;;  %1646 = vmatpush1.bf16.msra.mxu1 %v2942_v29  ;;  %v3013_v28 = vld [vmem:[%s4106_s9 + $0x64] ss:$8 sps:$4 sm:$0xff]   ;;  %v3011_v29 = vld [vmem:[%s4106_s9 + $0x60] ss:$8 sps:$4 sm:$0xff]  }
 0x2b8   :  { %1565 = vmatprep.subr.bf16.mxu0 %v2947_v30  ;;  %1647 = vmatprep.subr.bf16.mxu1 %v2950_v31  ;;  %v3016_v30 = vld [vmem:[%s4106_s9 + $0x74] ss:$8 sps:$4 sm:$0xff]   ;;  %v3014_v31 = vld [vmem:[%s4106_s9 + $0x70] ss:$8 sps:$4 sm:$0xff]  }
 0x2bb   :  { %1566 = vmatpush1.bf16.msra.mxu0 %v2945_v32  ;;  %1648 = vmatpush1.bf16.msra.mxu1 %v2948_v33  ;;  %v3019_v32 = vld [vmem:[%s4106_s9 + $0x84] ss:$8 sps:$4 sm:$0xff]   ;;  %v3017_v33 = vld [vmem:[%s4106_s9 + $0x80] ss:$8 sps:$4 sm:$0xff]  }
 0x2bc   :  { %1567 = vmatprep.subr.bf16.mxu0 %v2953_v34  ;;  %1649 = vmatprep.subr.bf16.mxu1 %v2956_v35  ;;  %v3022_v34 = vld [vmem:[%s4106_s9 + $0x94] ss:$8 sps:$4 sm:$0xff]   ;;  %v3020_v35 = vld [vmem:[%s4106_s9 + $0x90] ss:$8 sps:$4 sm:$0xff]  }
 0x2bf   :  { %1568 = vmatpush1.bf16.msra.mxu0 %v2951_v36  ;;  %1650 = vmatpush1.bf16.msra.mxu1 %v2954_v37  ;;  %v3025_v36 = vld [vmem:[%s4106_s9 + $0xa4] ss:$8 sps:$4 sm:$0xff]   ;;  %v3023_v37 = vld [vmem:[%s4106_s9 + $0xa0] ss:$8 sps:$4 sm:$0xff]  }
 0x2c0   :  { %1569 = vmatprep.subr.bf16.mxu0 %v2959_v38  ;;  %1651 = vmatprep.subr.bf16.mxu1 %v2962_v39  ;;  %v3028_v38 = vld [vmem:[%s4106_s9 + $0xb4] ss:$8 sps:$4 sm:$0xff]   ;;  %v3026_v39 = vld [vmem:[%s4106_s9 + $0xb0] ss:$8 sps:$4 sm:$0xff]  }
 0x2c3   :  { %1570 = vmatpush1.bf16.msra.mxu0 %v2957_v40  ;;  %1652 = vmatpush1.bf16.msra.mxu1 %v2960_v41  ;;  %v3031_v40 = vld [vmem:[%s4106_s9 + $0xc4] ss:$8 sps:$4 sm:$0xff]   ;;  %v3029_v41 = vld [vmem:[%s4106_s9 + $0xc0] ss:$8 sps:$4 sm:$0xff]  }
 0x2c4   :  { %1571 = vmatprep.subr.bf16.mxu0 %v2965_v42  ;;  %1653 = vmatprep.subr.bf16.mxu1 %v2968_v43  ;;  %v3034_v42 = vld [vmem:[%s4106_s9 + $0xd4] ss:$8 sps:$4 sm:$0xff]   ;;  %v3032_v43 = vld [vmem:[%s4106_s9 + $0xd0] ss:$8 sps:$4 sm:$0xff]  }
 0x2c7   :  { %1572 = vmatpush1.bf16.msra.mxu0 %v2963_v44  ;;  %1654 = vmatpush1.bf16.msra.mxu1 %v2966_v45  ;;  %v3037_v44 = vld [vmem:[%s4106_s9 + $0xe4] ss:$8 sps:$4 sm:$0xff]   ;;  %v3035_v45 = vld [vmem:[%s4106_s9 + $0xe0] ss:$8 sps:$4 sm:$0xff]  }
 0x2c8   :  { %1573 = vmatprep.subr.bf16.mxu0 %v2971_v46  ;;  %1655 = vmatprep.subr.bf16.mxu1 %v2974_v48  ;;  %v3040_v46 = vld [vmem:[%s4106_s9 + $0xf4] ss:$8 sps:$4 sm:$0xff]   ;;  %v3038_v48 = vld [vmem:[%s4106_s9 + $0xf0] ss:$8 sps:$4 sm:$0xff]  }
 0x2cb   :  { %1574 = vmatpush1.bf16.msra.mxu0 %v2969_v49  ;;  %1656 = vmatpush1.bf16.msra.mxu1 %v2972_v50  ;;  %v3043_v49 = vld [vmem:[%s4106_s9 + $0x104] ss:$8 sps:$4 sm:$0xff]  }
 0x2cc   :  { %1575 = vmatprep.subr.bf16.mxu0 %v2977_v51  ;;  %1657 = vmatprep.subr.bf16.mxu1 %v2980_v52  ;;  %v3089_v50 = vld [vmem:[%s4108_s11 + $0x40] sm:$0xff]   ;;  %v3091_v52 = vld [vmem:[%s4108_s11 + $0x48] sm:$0xff]  }
 0x2cd   :  { %v3090_v51 = vld [vmem:[%s4108_s11] sm:$0xff]  }
 0x2cf   :  { %1576 = vmatpush1.bf16.msra.mxu0 %v2975_v54  ;;  %1658 = vmatpush1.bf16.msra.mxu1 %v2978_v55  ;;  %v3092_v54 = vld [vmem:[%s4108_s11 + $0x8] sm:$0xff]   ;;  %v3093_v55 = vld [vmem:[%s4108_s11 + $0x50] sm:$0xff]  }
 0x2d0   :  { %1577 = vmatprep.subr.bf16.mxu0 %v2983_v57  ;;  %1659 = vmatprep.subr.bf16.mxu1 %v2986_v58  ;;  %v3094_v57 = vld [vmem:[%s4108_s11 + $0x10] sm:$0xff]   ;;  %v3095_v58 = vld [vmem:[%s4108_s11 + $0x58] sm:$0xff]  }
 0x2d1   :  { %v703_v1 = vpop.f32.mrb[4].mxu1 }
 0x2d2   :  { %v704_v47 = vadd.f32 %v703_v1, %v299_v59  ;;  %v705_v2 = vpop.f32.mrb[5].mxu1  ;;  %v3096_v59 = vld [vmem:[%s4108_s11 + $0x18] sm:$0xff]  }
 0x2d3   :  { %v706_v3 = vadd.f32 %v705_v2, %v303_v60  ;;  %v707_v4 = vpop.f32.mrb[6].mxu1  ;;  %1578 = vmatpush1.bf16.msra.mxu0 %v2981_v61  ;;  %1660 = vmatpush1.bf16.msra.mxu1 %v2984_v62  ;;  %v3097_v60 = vld [vmem:[%s4108_s11 + $0x60] sm:$0xff]   ;;  %v3099_v62 = vld [vmem:[%s4108_s11 + $0x68] sm:$0xff]  }
 0x2d4   :  { %v712_v7 = vmax.f32 %v704_v47, 0.0  ;;  %v708_v8 = vpop.f32.mrb[7].mxu1  ;;  %1579 = vmatprep.subr.bf16.mxu0 %v2989_v63  ;;  %1661 = vmatprep.subr.bf16.mxu1 %v2992_v0  ;;  %v3098_v61 = vld [vmem:[%s4108_s11 + $0x20] sm:$0xff]   ;;  %v3100_v63 = vld [vmem:[%s4108_s11 + $0x28] sm:$0xff]  }
 0x2d5   :  { %v713_v10 = vmax.f32 %v706_v3, 0.0  ;;  %v3967_v0 = vld [vmem:[%s4109_s8] sm:$0xf] }
 0x2d6   :  { %v716_v13 = vpack.c.bf16 %v712_v7, %v712_v7  ;;  %v851_v1 = vrot.slane %v3967_v0, %v3396_v20  ;;  %v855_v47 = vrot.slane %v3967_v0, %v3402_v22  ;;  %v863_v2 = vrot.slane %v3967_v0, %v302_v56  ;;  %v3041_v56 = vld [vmem:[%s4106_s9 + $0x100] ss:$8 sps:$4 sm:$0xff]  }
 0x2d7   :  { %v717_v11 = vpack.c.bf16 %v713_v10, %v713_v10  ;;  %1580 = vmatpush1.bf16.msra.mxu0 %v2987_v5  ;;  %1662 = vmatpush1.bf16.msra.mxu1 %v2990_v6 }
 0x2d8   :  { %2076 = vmatprep.subr.bf16.mxu0 %v2995_v9  ;;  %2642 = vmatprep.subr.bf16.mxu1 %v3089_v50  ;;  %v3080_v50 = vld [vmem:[%s4106_s9 + $0x1d0] ss:$8 sps:$4 sm:$0xff]  }
 0x2d9   :  { %1581 = vmatprep.mubr.bf16.mxu0 %v717_v11  ;;  %1663 = vmatprep.mubr.bf16.mxu1 %v717_v11 }
 0x2da   :  { %1582 = vmatmul.mubr.bf16.vlgmr.msra.gmra.mrb[8].mxu0 %v716_v13  ;;  %1664 = vmatmul.mubr.bf16.vlgmr.msra.gmra.mrb[8].mxu1 %v716_v13 }
 0x2db   :  { %2077 = vmatpush1.bf16.msra.mxu0 %v2993_v12  ;;  %2643 = vmatpush3.bf16.msra.mxu1 %v3090_v51  ;;  %v859_v51 = vrot.slane %v3967_v0, %v298_v53 }
 0x2dc   :  { %2078 = vmatprep.subr.bf16.mxu0 %v2998_v15  ;;  %2644 = vmatprep.subr.bf16.mxu1 %v3091_v52  ;;  %v3085_v52 = vld [vmem:[%s4106_s9 + $0x1e4] ss:$8 sps:$4 sm:$0xff]  }
 0x2df   :  { %2079 = vmatpush1.bf16.msra.mxu0 %v2996_v16  ;;  %2645 = vmatpush3.bf16.msra.mxu1 %v3092_v54  ;;  %v3083_v54 = vld [vmem:[%s4106_s9 + $0x1e0] ss:$8 sps:$4 sm:$0xff]  }
 0x2e0   :  { %2080 = vmatprep.subr.bf16.mxu0 %v3001_v18  ;;  %2646 = vmatprep.subr.bf16.mxu1 %v3093_v55 }
 0x2e3   :  { %2081 = vmatpush1.bf16.msra.mxu0 %v2999_v19  ;;  %2647 = vmatpush3.bf16.msra.mxu1 %v3094_v57  ;;  %v3088_v57 = vld [vmem:[%s4106_s9 + $0x1f4] ss:$8 sps:$4 sm:$0xff]  }
 0x2e4   :  { %2082 = vmatprep.subr.bf16.mxu0 %v3004_v21  ;;  %2648 = vmatprep.subr.bf16.mxu1 %v3095_v58 }
 0x2e7   :  { %2083 = vmatpush1.bf16.msra.mxu0 %v3002_v23  ;;  %2649 = vmatpush3.bf16.msra.mxu1 %v3096_v59  ;;  %v3046_v23 = vld [vmem:[%s4106_s9 + $0x114] ss:$8 sps:$4 sm:$0xff]  }
 0x2e8   :  { %2084 = vmatprep.subr.bf16.mxu0 %v3007_v24  ;;  %2650 = vmatprep.subr.bf16.mxu1 %v3097_v60  ;;  %v3101_v59 = vld [vmem:[%s4108_s11 + $0x70] sm:$0xff]  }
 0x2e9   :  { %v3102_v60 = vld [vmem:[%s4108_s11 + $0x30] sm:$0xff]  }
 0x2eb   :  { %2085 = vmatpush1.bf16.msra.mxu0 %v3005_v25  ;;  %2651 = vmatpush3.bf16.msra.mxu1 %v3098_v61  ;;  %v3044_v25 = vld [vmem:[%s4106_s9 + $0x110] ss:$8 sps:$4 sm:$0xff]  }
 0x2ec   :  { %2086 = vmatprep.subr.bf16.mxu0 %v3010_v26  ;;  %2652 = vmatprep.subr.bf16.mxu1 %v3099_v62  ;;  %v3049_v26 = vld [vmem:[%s4106_s9 + $0x124] ss:$8 sps:$4 sm:$0xff]   ;;  %v3103_v61 = vld [vmem:[%s4108_s11 + $0x78] sm:$0xff]  }
 0x2ed   :  { %v3104_v62 = vld [vmem:[%s4108_s11 + $0x38] sm:$0xff]  }
 0x2ef   :  { %2087 = vmatpush1.bf16.msra.mxu0 %v3008_v27  ;;  %2653 = vmatpush3.bf16.msra.mxu1 %v3100_v63  ;;  %v3047_v27 = vld [vmem:[%s4106_s9 + $0x120] ss:$8 sps:$4 sm:$0xff]  }
 0x2f0   :  { %2088 = vmatprep.subr.bf16.mxu0 %v3013_v28  ;;  %v3052_v28 = vld [vmem:[%s4106_s9 + $0x134] ss:$8 sps:$4 sm:$0xff]   ;;  %2654 = vmatprep.subr.bf16.mxu1 %v3101_v59  ;;  %v1744_v63 = vld [vmem:[%s4110_s10] sm:$0x3] }
 0x2f1   :  { %v1749_v0 = vrot.slane %v1744_v63, %v3396_v20 }
 0x2f3   :  { %2089 = vmatpush1.bf16.msra.mxu0 %v3011_v29  ;;  %v3050_v29 = vld [vmem:[%s4106_s9 + $0x130] ss:$8 sps:$4 sm:$0xff]   ;;  %2655 = vmatpush3.bf16.msra.mxu1 %v3102_v60 }
 0x2f4   :  { %2090 = vmatprep.subr.bf16.mxu0 %v3016_v30  ;;  %v3055_v30 = vld [vmem:[%s4106_s9 + $0x144] ss:$8 sps:$4 sm:$0xff]   ;;  %2656 = vmatprep.subr.bf16.mxu1 %v3103_v61 }
 0x2f7   :  { %2091 = vmatpush1.bf16.msra.mxu0 %v3014_v31  ;;  %v3053_v31 = vld [vmem:[%s4106_s9 + $0x140] ss:$8 sps:$4 sm:$0xff]   ;;  %2657 = vmatpush3.bf16.msra.mxu1 %v3104_v62 }
 0x2f8   :  { %2092 = vmatprep.subr.bf16.mxu0 %v3019_v32  ;;  %v3058_v32 = vld [vmem:[%s4106_s9 + $0x154] ss:$8 sps:$4 sm:$0xff]  }
 0x2fb   :  { %2093 = vmatpush1.bf16.msra.mxu0 %v3017_v33  ;;  %v3056_v33 = vld [vmem:[%s4106_s9 + $0x150] ss:$8 sps:$4 sm:$0xff]  }
 0x2fc   :  { %2094 = vmatprep.subr.bf16.mxu0 %v3022_v34  ;;  %v3061_v34 = vld [vmem:[%s4106_s9 + $0x164] ss:$8 sps:$4 sm:$0xff]  }
 0x2ff   :  { %2095 = vmatpush1.bf16.msra.mxu0 %v3020_v35  ;;  %v3059_v35 = vld [vmem:[%s4106_s9 + $0x160] ss:$8 sps:$4 sm:$0xff]  }
 0x300   :  { %2096 = vmatprep.subr.bf16.mxu0 %v3025_v36  ;;  %v3064_v36 = vld [vmem:[%s4106_s9 + $0x174] ss:$8 sps:$4 sm:$0xff]  }
 0x303   :  { %2097 = vmatpush1.bf16.msra.mxu0 %v3023_v37  ;;  %v3062_v37 = vld [vmem:[%s4106_s9 + $0x170] ss:$8 sps:$4 sm:$0xff]  }
 0x304   :  { %2098 = vmatprep.subr.bf16.mxu0 %v3028_v38  ;;  %v3067_v38 = vld [vmem:[%s4106_s9 + $0x184] ss:$8 sps:$4 sm:$0xff]  }
 0x307   :  { %2099 = vmatpush1.bf16.msra.mxu0 %v3026_v39  ;;  %v3065_v39 = vld [vmem:[%s4106_s9 + $0x180] ss:$8 sps:$4 sm:$0xff]  }
 0x308   :  { %2100 = vmatprep.subr.bf16.mxu0 %v3031_v40  ;;  %v3070_v40 = vld [vmem:[%s4106_s9 + $0x194] ss:$8 sps:$4 sm:$0xff]  }
 0x30b   :  { %2101 = vmatpush1.bf16.msra.mxu0 %v3029_v41  ;;  %v3068_v41 = vld [vmem:[%s4106_s9 + $0x190] ss:$8 sps:$4 sm:$0xff]  }
 0x30c   :  { %2102 = vmatprep.subr.bf16.mxu0 %v3034_v42  ;;  %v3073_v42 = vld [vmem:[%s4106_s9 + $0x1a4] ss:$8 sps:$4 sm:$0xff]  }
 0x30f   :  { %2103 = vmatpush1.bf16.msra.mxu0 %v3032_v43  ;;  %v3071_v43 = vld [vmem:[%s4106_s9 + $0x1a0] ss:$8 sps:$4 sm:$0xff]  }
 0x310   :  { %2104 = vmatprep.subr.bf16.mxu0 %v3037_v44  ;;  %v3076_v44 = vld [vmem:[%s4106_s9 + $0x1b4] ss:$8 sps:$4 sm:$0xff]  }
 0x313   :  { %2105 = vmatpush1.bf16.msra.mxu0 %v3035_v45  ;;  %v3074_v45 = vld [vmem:[%s4106_s9 + $0x1b0] ss:$8 sps:$4 sm:$0xff]  }
 0x314   :  { %2106 = vmatprep.subr.bf16.mxu0 %v3040_v46  ;;  %v3079_v46 = vld [vmem:[%s4106_s9 + $0x1c4] ss:$8 sps:$4 sm:$0xff]  }
 0x317   :  { %2107 = vmatpush1.bf16.msra.mxu0 %v3038_v48  ;;  %v3077_v48 = vld [vmem:[%s4106_s9 + $0x1c0] ss:$8 sps:$4 sm:$0xff]  }
 0x318   :  { %2117 = vmatprep.subr.bf16.mxu0 %v3043_v49  ;;  %v3082_v49 = vld [vmem:[%s4106_s9 + $0x1d4] ss:$8 sps:$4 sm:$0xff]  }
 0x3ad   :  { %v1583_v3 = vpop.f32.mrb[8].mxu0  ;;  %v3976_v4 = vpop.f32.mrb[8].mxu1 }
 0x3ae   :  { %v2670_v5 = vadd.f32 %v1583_v3, %v851_v1  ;;  %v1585_v6 = vpop.f32.mrb[9].mxu0  ;;  %v1667_v7 = vpop.f32.mrb[9].mxu1  ;;  %v2672_v55 = vadd.f32 %v3976_v4, %v859_v51  ;;  %v1753_v1 = vrot.slane %v1744_v63, %v3402_v22 }
 0x3af   :  { %v2671_v8 = vadd.f32 %v1585_v6, %v855_v47  ;;  %v2673_v9 = vadd.f32 %v1667_v7, %v863_v2  ;;  %v1587_v10 = vpop.f32.mrb[10].mxu0  ;;  %v1669_v11 = vpop.f32.mrb[10].mxu1 }
 0x3b0   :  { %v1672_v12 = vmax.f32 %v2670_v5, 0.0  ;;  %v1588_v13 = vpop.f32.mrb[11].mxu0  ;;  %v1670_v15 = vpop.f32.mrb[11].mxu1  ;;  %v1674_v53 = vmax.f32 %v2672_v55, 0.0 }
 0x3b1   :  { %v1673_v16 = vmax.f32 %v2671_v8, 0.0  ;;  %v1675_v18 = vmax.f32 %v2673_v9, 0.0 }
 0x3b2   :  { %v1676_v21 = vpack.c.bf16 %v1672_v12, %v1672_v12  ;;  %v1678_v58 = vpack.c.bf16 %v1674_v53, %v1674_v53  ;;  %v2622_v12 = vld [vmem:[%s4111_s12] ss:$0 sm:$0xff] }
 0x3b3   :  { %v1677_v19 = vpack.c.bf16 %v1673_v16, %v1673_v16  ;;  %v1679_v24 = vpack.c.bf16 %v1675_v18, %v1675_v18 }
 0x3b5   :  { %2108 = vmatprep.mubr.bf16.mxu0 %v1677_v19 }
 0x3b6   :  { %2109 = vmatmul.mubr.bf16.vlgmr.msra.gmra.mrb[12].mxu0 %v1676_v21  ;;  %v2338_v21 = vand.u32 127, %v123_v14 }
 0x3b7   :  { %2118 = vmatpush1.bf16.msra.mxu0 %v3041_v56  ;;  %2149 = vmatprep.mubr.bf16.mxu0 %v1679_v24 }
 0x3b8   :  { %2119 = vmatprep.subr.bf16.mxu0 %v3046_v23  ;;  %vm2339_vm5 = vcmp.lt.s32.totalorder %v2338_v21, 3 }
 0x3bb   :  { %2120 = vmatpush1.bf16.msra.mxu0 %v3044_v25 }
 0x3bc   :  { %2121 = vmatprep.subr.bf16.mxu0 %v3049_v26 }
 0x3bf   :  { %2122 = vmatpush1.bf16.msra.mxu0 %v3047_v27 }
 0x3c0   :  { %2123 = vmatprep.subr.bf16.mxu0 %v3052_v28 }
 0x3c3   :  { %2124 = vmatpush1.bf16.msra.mxu0 %v3050_v29 }
 0x3c4   :  { %2125 = vmatprep.subr.bf16.mxu0 %v3055_v30 }
 0x3c7   :  { %2126 = vmatpush1.bf16.msra.mxu0 %v3053_v31 }
 0x3c8   :  { %2127 = vmatprep.subr.bf16.mxu0 %v3058_v32 }
 0x3cb   :  { %2128 = vmatpush1.bf16.msra.mxu0 %v3056_v33 }
 0x3cc   :  { %2129 = vmatprep.subr.bf16.mxu0 %v3061_v34 }
 0x3cf   :  { %2130 = vmatpush1.bf16.msra.mxu0 %v3059_v35 }
 0x3d0   :  { %2131 = vmatprep.subr.bf16.mxu0 %v3064_v36 }
 0x3d3   :  { %2132 = vmatpush1.bf16.msra.mxu0 %v3062_v37 }
 0x3d4   :  { %2133 = vmatprep.subr.bf16.mxu0 %v3067_v38 }
 0x3d7   :  { %2134 = vmatpush1.bf16.msra.mxu0 %v3065_v39 }
 0x3d8   :  { %2135 = vmatprep.subr.bf16.mxu0 %v3070_v40 }
 0x3db   :  { %2136 = vmatpush1.bf16.msra.mxu0 %v3068_v41 }
 0x3dc   :  { %2137 = vmatprep.subr.bf16.mxu0 %v3073_v42 }
 0x3df   :  { %2138 = vmatpush1.bf16.msra.mxu0 %v3071_v43 }
 0x3e0   :  { %2139 = vmatprep.subr.bf16.mxu0 %v3076_v44 }
 0x3e3   :  { %2140 = vmatpush1.bf16.msra.mxu0 %v3074_v45 }
 0x3e4   :  { %2141 = vmatprep.subr.bf16.mxu0 %v3079_v46 }
 0x3e7   :  { %2142 = vmatpush1.bf16.msra.mxu0 %v3077_v48 }
 0x3e8   :  { %2143 = vmatprep.subr.bf16.mxu0 %v3082_v49 }
 0x3eb   :  { %2144 = vmatpush1.bf16.msra.mxu0 %v3080_v50 }
 0x3ec   :  { %2145 = vmatprep.subr.bf16.mxu0 %v3085_v52 }
 0x3ef   :  { %2146 = vmatpush1.bf16.msra.mxu0 %v3083_v54 }
 0x3f0   :  { %2147 = vmatprep.subr.bf16.mxu0 %v3088_v57 }
 0x3f3   :  { %2148 = vmatpush1.bf16.msra.mxu0 %v3086_v17 }
 0x3f6   :  { %2150 = vmatmul.mubr.bf16.vlgmr.msra.gmra.mrb[12].mxu0 %v1678_v58 }
 0x4c9   :  { %v2151_v47 = vpop.f32.mrb[12].mxu0 }
 0x4ca   :  { %v2674_v2 = vadd.f32 %v2151_v47, %v1749_v0  ;;  %v2153_v3 = vpop.f32.mrb[13].mxu0 }
 0x4cb   :  { %v2675_v4 = vadd.f32 %v2153_v3, %v1753_v1  ;;  %v2155_v5 = vpop.f32.mrb[14].mxu0 }
 0x4cc   :  { %v2158_v6 = vmax.f32 %v2674_v2, 0.0  ;;  %v2156_v7 = vpop.f32.mrb[15].mxu0 }
 0x4cd   :  { %v2159_v8 = vmax.f32 %v2675_v4, 0.0 }
 0x4ce   :  { %v2160_v10 = vpack.c.bf16 %v2158_v6, %v2158_v6 }
 0x4cf   :  { %v2161_v9 = vpack.c.bf16 %v2159_v8, %v2159_v8 }
 0x4d1   :  { %2329 = vmatprep.mubr.bf16.mxu1 %v2161_v9 }
 0x4d2   :  { %2330 = vmatmul.mubr.bf16.vlgmr.msra.gmra.mrb[12].mxu1 %v2160_v10 }
 0x5a5   :  { %v2658_v11 = vpop.f32.mrb[12].mxu1 }
 0x5a6   :  { %v2659_v20 = vpop.f32.mrb[13].mxu1 }
 0x5a7   :  { %v2660_v13 = vadd.f32 %v2659_v20, %v2658_v11  ;;  %v2661_v22 = vpop.f32.mrb[14].mxu1 }
 0x5a8   :  { %v2662_v15 = vpop.f32.mrb[15].mxu1 }
 0x5a9   :  { %v2332_v16 = vadd.f32 %v2660_v13, %v2622_v12 }
 0x5ab   :  { %v2639_v18 = vmul.f32 -1.442695, %v2332_v16 }
 0x5ad   :  { %3105 = vpow2.f32 %v2639_v18 }
 0x5ae   :  { %3107 = vtanh.f32 %v2332_v16 }
 0x5b7   :  { %v3106_v19 = vpop.eup %3105 }
 0x5b8   :  { %v2344_v56 = vadd.f32 1.0, %v3106_v19  ;;  %v3108_v23 = vpop.eup %3107 }
 0x5ba   :  { %3109 = vrcp.f32 %v2344_v56 }
 0x5c4   :  { %v3110_v24 = vpop.eup %3109 }
 0x5c5   :  { %v2347_v25 = vsel %vm2339_vm5, %v3108_v23, %v3110_v24 }
 0x5c6   :  { %2349 = vst.msk [vmem:[%s4112_s13] sm:$0xff] %vm2348_vm6, %v2347_v25 }

</bundles_post_ra>
